<compile_context>
chip_gen: v5e
topology: v5e:2x2
jax: 0.10.0
libtpu: 0.0.40
codegen_flags: <defaults>
</compile_context>

<pallas_src>
import jax
import jax.numpy as jnp
from jax.experimental import pallas as pl
from jax.experimental.pallas import tpu as pltpu


def _mish(x):
    # mish(x) = min(x * tanh(softplus(x)), 6), one exp + one approx reciprocal.
    xc = jnp.minimum(x, 20.0)            # pre-clamp so (1+e^x)^2 cannot overflow f32
    e = jnp.exp(xc)
    n = (1.0 + e) * (1.0 + e)            # e^{2*softplus(x)} = (1+e^x)^2
    t = (n - 1.0) * pl.reciprocal(n + 1.0, approx=True)   # tanh(softplus(x))
    return jnp.minimum(x * t, 6.0)


def value_net_kernel(s_ref, w1_ref, b1_ref, w2_ref, b2_ref,
                     w3_ref, b3_ref, w4_ref, b4_ref, o_ref):
    x = s_ref[...]
    h = _mish(jnp.dot(x, w1_ref[...], preferred_element_type=jnp.float32) + b1_ref[...])
    h = _mish(jnp.dot(h, w2_ref[...], preferred_element_type=jnp.float32) + b2_ref[...])
    h = _mish(jnp.dot(h, w3_ref[...], preferred_element_type=jnp.float32) + b3_ref[...])
    # Final Linear(half -> 1): N=1 MXU matmul, stored as an (eff_b, 1) block.
    o_ref[...] = jnp.dot(h, w4_ref[...], preferred_element_type=jnp.float32) + b4_ref[...]


def _round_up(x, m):
    return (x + m - 1) // m * m


def value_network_forward(state, params, *, block_b=2048, min_blocks=2):
    """state: [B, state_dim] float32; params: dict of (w, b) per layer.

    Returns [B, 1] float32, matching the PyTorch module's forward.
    """
    B, state_dim = state.shape
    w1, b1 = params["l1"]
    w2, b2 = params["l2"]
    w3, b3 = params["l3"]
    w4, b4 = params["l4"]
    hidden = w1.shape[1]
    half = w3.shape[1]

    # Batch tile: as large as requested, clamped to the batch, multiple of 8 sublanes.
    eff_b = max(8, min(_round_up(block_b, 8), _round_up(B, 8)))
    # Keep >= min_blocks grid steps when B allows so v7x's two TensorCores both get work.
    if B >= min_blocks * 8 and pl.cdiv(B, eff_b) < min_blocks:
        eff_b = _round_up(pl.cdiv(B, min_blocks), 8)
    num_blocks = pl.cdiv(B, eff_b)

    # Weights/biases are tiny; constant index_map -> resident in VMEM across the grid.
    full = lambda shape: pl.BlockSpec(shape, lambda i, _s=shape: (0,) * len(_s))

    n_params = sum(int(w.size) + int(b.size) for (w, b) in params.values())
    cost = pl.CostEstimate(
        flops=2 * B * (state_dim * hidden + hidden * hidden + hidden * half + half),
        transcendentals=B * (2 * hidden + half),        # one exp per hidden element
        bytes_accessed=4 * (B * state_dim + B + n_params),
    )

    return pl.pallas_call(
        value_net_kernel,
        out_shape=jax.ShapeDtypeStruct((B, 1), jnp.float32),
        grid=(num_blocks,),
        in_specs=[
            pl.BlockSpec((eff_b, state_dim), lambda i: (i, 0)),   # state tile
            full((state_dim, hidden)), full((1, hidden)),         # linear1
            full((hidden, hidden)),    full((1, hidden)),         # linear2
            full((hidden, half)),      full((1, half)),           # linear2_3
            full((half, 1)),           full((1, 1)),              # linear3
        ],
        out_specs=pl.BlockSpec((eff_b, 1), lambda i: (i, 0)),
        compiler_params=pltpu.CompilerParams(
            dimension_semantics=("parallel",)),
        cost_estimate=cost,
    )(state, w1, b1, w2, b2, w3, b3, w4, b4)


def init_params(key, state_dim, hidden_dim, init_w=0.003):
    """Deterministic uniform(-init_w, init_w) init, mirroring the PyTorch module."""
    dims = [(state_dim, hidden_dim),
            (hidden_dim, hidden_dim),
            (hidden_dim, hidden_dim // 2),
            (hidden_dim // 2, 1)]
    names = ["l1", "l2", "l3", "l4"]
    params = {}
    for name, (din, dout) in zip(names, dims):
        key, kw, kb = jax.random.split(key, 3)
        w = jax.random.uniform(kw, (din, dout), jnp.float32, -init_w, init_w)
        b = jax.random.uniform(kb, (1, dout), jnp.float32, -init_w, init_w)
        params[name] = (w, b)
    return params


def _ref_mish(x):
    # Reference mish exactly as the PyTorch module: clamp(x * tanh(softplus(x)), max=6).
    sp = jnp.maximum(x, 0.0) + jnp.log1p(jnp.exp(-jnp.abs(x)))
    return jnp.minimum(x * jnp.tanh(sp), 6.0)


def reference_forward(state, params):
    x = state
    for name in ["l1", "l2", "l3"]:
        w, b = params[name]
        x = _ref_mish(x @ w + b)
    w, b = params["l4"]
    return x @ w + b


if __name__ == "__main__":
    key = jax.random.PRNGKey(0)
    # 200 rows exercises the partial last tile (no host-side padding) and a 2-step
    # parallel grid; hidden_dim=32 / half=16 match the module structure.
    batch, state_dim, hidden_dim = 200, 16, 32

    key, ks = jax.random.split(key)
    state = jax.random.normal(ks, (batch, state_dim), jnp.float32)
    params = init_params(key, state_dim, hidden_dim)

    ref = reference_forward(state, params)

    # Explicit small tile (2 full-ish blocks, second one partial).
    out_small = jax.block_until_ready(value_network_forward(state, params, block_b=128))
    # Default tile path (exercises the ">= 2 grid steps" split for v7x).
    out_default = jax.block_until_ready(value_network_forward(state, params))

    assert out_small.shape == (batch, 1)
    assert out_default.shape == (batch, 1)
    assert jnp.allclose(out_small, ref, atol=1e-5, rtol=1e-5)
    assert jnp.allclose(out_default, ref, atol=1e-5, rtol=1e-5)
    print("KERNEL_OK")
</pallas_src>

<mosaic_0001>
module attributes {stable_mosaic.version = 11 : i64} {
  func.func @value_net_kernel(%arg0: i32, %arg1: memref<128x16xf32, #tpu.memory_space<vmem>>, %arg2: memref<16x32xf32, #tpu.memory_space<vmem>>, %arg3: memref<1x32xf32, #tpu.memory_space<vmem>>, %arg4: memref<32x32xf32, #tpu.memory_space<vmem>>, %arg5: memref<1x32xf32, #tpu.memory_space<vmem>>, %arg6: memref<32x16xf32, #tpu.memory_space<vmem>>, %arg7: memref<1x16xf32, #tpu.memory_space<vmem>>, %arg8: memref<16x1xf32, #tpu.memory_space<vmem>>, %arg9: memref<1x1xf32, #tpu.memory_space<vmem>>, %arg10: memref<128x1xf32, #tpu.memory_space<vmem>>) attributes {dimension_semantics = [#tpu.dimension_semantics<parallel>], iteration_bounds = array<i64: 2>, scalar_prefetch = 0 : i64, scratch_operands = 0 : i64, tpu.core_type = #tpu.core_type<tc>, window_params = [{transform_indices = @transform_0, window_bounds = array<i64: 128, 16>}, {pipeline_mode = #tpu.pipeline_mode<synchronous>, transform_indices = @transform_1, window_bounds = array<i64: 16, 32>}, {pipeline_mode = #tpu.pipeline_mode<synchronous>, transform_indices = @transform_2, window_bounds = array<i64: 1, 32>}, {pipeline_mode = #tpu.pipeline_mode<synchronous>, transform_indices = @transform_3, window_bounds = array<i64: 32, 32>}, {pipeline_mode = #tpu.pipeline_mode<synchronous>, transform_indices = @transform_4, window_bounds = array<i64: 1, 32>}, {pipeline_mode = #tpu.pipeline_mode<synchronous>, transform_indices = @transform_5, window_bounds = array<i64: 32, 16>}, {pipeline_mode = #tpu.pipeline_mode<synchronous>, transform_indices = @transform_6, window_bounds = array<i64: 1, 16>}, {pipeline_mode = #tpu.pipeline_mode<synchronous>, transform_indices = @transform_7, window_bounds = array<i64: 16, 1>}, {pipeline_mode = #tpu.pipeline_mode<synchronous>, transform_indices = @transform_8, window_bounds = array<i64: 1, 1>}, {transform_indices = @transform_9, window_bounds = array<i64: 128, 1>}]} {
    %c0 = arith.constant 0 : index
    %c0_0 = arith.constant 0 : index
    %0 = vector.load %arg1[%c0, %c0_0] : memref<128x16xf32, #tpu.memory_space<vmem>>, vector<128x16xf32>
    %c0_1 = arith.constant 0 : index
    %c0_2 = arith.constant 0 : index
    %1 = vector.load %arg2[%c0_1, %c0_2] : memref<16x32xf32, #tpu.memory_space<vmem>>, vector<16x32xf32>
    %cst = arith.constant dense<0.000000e+00> : vector<128x32xf32>
    %2 = tpu.matmul %0, %1, %cst {dimension_numbers = #tpu.dot_dimension_numbers<[1], [0], [0], [1], [0, 0, 1, 1], [], []>} : vector<128x16xf32>, vector<16x32xf32>, vector<128x32xf32> -> vector<128x32xf32>
    %c0_3 = arith.constant 0 : index
    %c0_4 = arith.constant 0 : index
    %3 = vector.load %arg3[%c0_3, %c0_4] : memref<1x32xf32, #tpu.memory_space<vmem>>, vector<1x32xf32>
    %4 = vector.broadcast %3 : vector<1x32xf32> to vector<128x32xf32>
    %5 = arith.addf %2, %4 : vector<128x32xf32>
    %cst_5 = arith.constant 2.000000e+01 : f32
    %6 = vector.broadcast %cst_5 : f32 to vector<128x32xf32>
    %7 = arith.minimumf %5, %6 : vector<128x32xf32>
    %8 = math.exp %7 : vector<128x32xf32>
    %cst_6 = arith.constant 1.000000e+00 : f32
    %9 = vector.broadcast %cst_6 : f32 to vector<128x32xf32>
    %10 = arith.addf %9, %8 : vector<128x32xf32>
    %cst_7 = arith.constant 1.000000e+00 : f32
    %11 = vector.broadcast %cst_7 : f32 to vector<128x32xf32>
    %12 = arith.addf %11, %8 : vector<128x32xf32>
    %13 = arith.mulf %10, %12 : vector<128x32xf32>
    %cst_8 = arith.constant 1.000000e+00 : f32
    %14 = vector.broadcast %cst_8 : f32 to vector<128x32xf32>
    %15 = arith.subf %13, %14 : vector<128x32xf32>
    %cst_9 = arith.constant 1.000000e+00 : f32
    %16 = vector.broadcast %cst_9 : f32 to vector<128x32xf32>
    %17 = arith.addf %13, %16 : vector<128x32xf32>
    %18 = tpu.reciprocal %17 {approx = true} : vector<128x32xf32> -> vector<128x32xf32>
    %19 = arith.mulf %15, %18 : vector<128x32xf32>
    %20 = arith.mulf %5, %19 : vector<128x32xf32>
    %cst_10 = arith.constant 6.000000e+00 : f32
    %21 = vector.broadcast %cst_10 : f32 to vector<128x32xf32>
    %22 = arith.minimumf %20, %21 : vector<128x32xf32>
    %c0_11 = arith.constant 0 : index
    %c0_12 = arith.constant 0 : index
    %23 = vector.load %arg4[%c0_11, %c0_12] : memref<32x32xf32, #tpu.memory_space<vmem>>, vector<32x32xf32>
    %cst_13 = arith.constant dense<0.000000e+00> : vector<128x32xf32>
    %24 = tpu.matmul %22, %23, %cst_13 {dimension_numbers = #tpu.dot_dimension_numbers<[1], [0], [0], [1], [0, 0, 1, 1], [], []>} : vector<128x32xf32>, vector<32x32xf32>, vector<128x32xf32> -> vector<128x32xf32>
    %c0_14 = arith.constant 0 : index
    %c0_15 = arith.constant 0 : index
    %25 = vector.load %arg5[%c0_14, %c0_15] : memref<1x32xf32, #tpu.memory_space<vmem>>, vector<1x32xf32>
    %26 = vector.broadcast %25 : vector<1x32xf32> to vector<128x32xf32>
    %27 = arith.addf %24, %26 : vector<128x32xf32>
    %cst_16 = arith.constant 2.000000e+01 : f32
    %28 = vector.broadcast %cst_16 : f32 to vector<128x32xf32>
    %29 = arith.minimumf %27, %28 : vector<128x32xf32>
    %30 = math.exp %29 : vector<128x32xf32>
    %cst_17 = arith.constant 1.000000e+00 : f32
    %31 = vector.broadcast %cst_17 : f32 to vector<128x32xf32>
    %32 = arith.addf %31, %30 : vector<128x32xf32>
    %cst_18 = arith.constant 1.000000e+00 : f32
    %33 = vector.broadcast %cst_18 : f32 to vector<128x32xf32>
    %34 = arith.addf %33, %30 : vector<128x32xf32>
    %35 = arith.mulf %32, %34 : vector<128x32xf32>
    %cst_19 = arith.constant 1.000000e+00 : f32
    %36 = vector.broadcast %cst_19 : f32 to vector<128x32xf32>
    %37 = arith.subf %35, %36 : vector<128x32xf32>
    %cst_20 = arith.constant 1.000000e+00 : f32
    %38 = vector.broadcast %cst_20 : f32 to vector<128x32xf32>
    %39 = arith.addf %35, %38 : vector<128x32xf32>
    %40 = tpu.reciprocal %39 {approx = true} : vector<128x32xf32> -> vector<128x32xf32>
    %41 = arith.mulf %37, %40 : vector<128x32xf32>
    %42 = arith.mulf %27, %41 : vector<128x32xf32>
    %cst_21 = arith.constant 6.000000e+00 : f32
    %43 = vector.broadcast %cst_21 : f32 to vector<128x32xf32>
    %44 = arith.minimumf %42, %43 : vector<128x32xf32>
    %c0_22 = arith.constant 0 : index
    %c0_23 = arith.constant 0 : index
    %45 = vector.load %arg6[%c0_22, %c0_23] : memref<32x16xf32, #tpu.memory_space<vmem>>, vector<32x16xf32>
    %cst_24 = arith.constant dense<0.000000e+00> : vector<128x16xf32>
    %46 = tpu.matmul %44, %45, %cst_24 {dimension_numbers = #tpu.dot_dimension_numbers<[1], [0], [0], [1], [0, 0, 1, 1], [], []>} : vector<128x32xf32>, vector<32x16xf32>, vector<128x16xf32> -> vector<128x16xf32>
    %c0_25 = arith.constant 0 : index
    %c0_26 = arith.constant 0 : index
    %47 = vector.load %arg7[%c0_25, %c0_26] : memref<1x16xf32, #tpu.memory_space<vmem>>, vector<1x16xf32>
    %48 = vector.broadcast %47 : vector<1x16xf32> to vector<128x16xf32>
    %49 = arith.addf %46, %48 : vector<128x16xf32>
    %cst_27 = arith.constant 2.000000e+01 : f32
    %50 = vector.broadcast %cst_27 : f32 to vector<128x16xf32>
    %51 = arith.minimumf %49, %50 : vector<128x16xf32>
    %52 = math.exp %51 : vector<128x16xf32>
    %cst_28 = arith.constant 1.000000e+00 : f32
    %53 = vector.broadcast %cst_28 : f32 to vector<128x16xf32>
    %54 = arith.addf %53, %52 : vector<128x16xf32>
    %cst_29 = arith.constant 1.000000e+00 : f32
    %55 = vector.broadcast %cst_29 : f32 to vector<128x16xf32>
    %56 = arith.addf %55, %52 : vector<128x16xf32>
    %57 = arith.mulf %54, %56 : vector<128x16xf32>
    %cst_30 = arith.constant 1.000000e+00 : f32
    %58 = vector.broadcast %cst_30 : f32 to vector<128x16xf32>
    %59 = arith.subf %57, %58 : vector<128x16xf32>
    %cst_31 = arith.constant 1.000000e+00 : f32
    %60 = vector.broadcast %cst_31 : f32 to vector<128x16xf32>
    %61 = arith.addf %57, %60 : vector<128x16xf32>
    %62 = tpu.reciprocal %61 {approx = true} : vector<128x16xf32> -> vector<128x16xf32>
    %63 = arith.mulf %59, %62 : vector<128x16xf32>
    %64 = arith.mulf %49, %63 : vector<128x16xf32>
    %cst_32 = arith.constant 6.000000e+00 : f32
    %65 = vector.broadcast %cst_32 : f32 to vector<128x16xf32>
    %66 = arith.minimumf %64, %65 : vector<128x16xf32>
    %c0_33 = arith.constant 0 : index
    %c0_34 = arith.constant 0 : index
    %67 = vector.load %arg8[%c0_33, %c0_34] : memref<16x1xf32, #tpu.memory_space<vmem>>, vector<16x1xf32>
    %cst_35 = arith.constant dense<0.000000e+00> : vector<128x1xf32>
    %68 = tpu.matmul %66, %67, %cst_35 {dimension_numbers = #tpu.dot_dimension_numbers<[1], [0], [0], [1], [0, 0, 1, 1], [], []>} : vector<128x16xf32>, vector<16x1xf32>, vector<128x1xf32> -> vector<128x1xf32>
    %c0_36 = arith.constant 0 : index
    %c0_37 = arith.constant 0 : index
    %69 = vector.load %arg9[%c0_36, %c0_37] : memref<1x1xf32, #tpu.memory_space<vmem>>, vector<1x1xf32>
    %70 = vector.broadcast %69 : vector<1x1xf32> to vector<128x1xf32>
    %71 = arith.addf %68, %70 : vector<128x1xf32>
    %c0_38 = arith.constant 0 : index
    %c0_39 = arith.constant 0 : index
    %72 = vector.load %arg10[%c0_38, %c0_39] : memref<128x1xf32, #tpu.memory_space<vmem>>, vector<128x1xf32>
    tpu.vector_store %arg10[%c0_38, %c0_39], %71 {strides = array<i32>} : memref<128x1xf32, #tpu.memory_space<vmem>>, vector<128x1xf32>,
    return
  }
  func.func @transform_0(%arg0: i32) -> (i32, i32) {
    %c0_i32 = arith.constant 0 : i32
    %c0_i32_0 = arith.constant 0 : i32
    return %arg0, %c0_i32 : i32, i32
  }
  func.func @transform_1(%arg0: i32) -> (i32, i32) {
    %c0_i32 = arith.constant 0 : i32
    %c0_i32_0 = arith.constant 0 : i32
    %c0_i32_1 = arith.constant 0 : i32
    return %c0_i32, %c0_i32_0 : i32, i32
  }
  func.func @transform_2(%arg0: i32) -> (i32, i32) {
    %c0_i32 = arith.constant 0 : i32
    %c0_i32_0 = arith.constant 0 : i32
    %c0_i32_1 = arith.constant 0 : i32
    return %c0_i32, %c0_i32_0 : i32, i32
  }
  func.func @transform_3(%arg0: i32) -> (i32, i32) {
    %c0_i32 = arith.constant 0 : i32
    %c0_i32_0 = arith.constant 0 : i32
    %c0_i32_1 = arith.constant 0 : i32
    return %c0_i32, %c0_i32_0 : i32, i32
  }
  func.func @transform_4(%arg0: i32) -> (i32, i32) {
    %c0_i32 = arith.constant 0 : i32
    %c0_i32_0 = arith.constant 0 : i32
    %c0_i32_1 = arith.constant 0 : i32
    return %c0_i32, %c0_i32_0 : i32, i32
  }
  func.func @transform_5(%arg0: i32) -> (i32, i32) {
    %c0_i32 = arith.constant 0 : i32
    %c0_i32_0 = arith.constant 0 : i32
    %c0_i32_1 = arith.constant 0 : i32
    return %c0_i32, %c0_i32_0 : i32, i32
  }
  func.func @transform_6(%arg0: i32) -> (i32, i32) {
    %c0_i32 = arith.constant 0 : i32
    %c0_i32_0 = arith.constant 0 : i32
    %c0_i32_1 = arith.constant 0 : i32
    return %c0_i32, %c0_i32_0 : i32, i32
  }
  func.func @transform_7(%arg0: i32) -> (i32, i32) {
    %c0_i32 = arith.constant 0 : i32
    %c0_i32_0 = arith.constant 0 : i32
    %c0_i32_1 = arith.constant 0 : i32
    return %c0_i32, %c0_i32_0 : i32, i32
  }
  func.func @transform_8(%arg0: i32) -> (i32, i32) {
    %c0_i32 = arith.constant 0 : i32
    %c0_i32_0 = arith.constant 0 : i32
    %c0_i32_1 = arith.constant 0 : i32
    return %c0_i32, %c0_i32_0 : i32, i32
  }
  func.func @transform_9(%arg0: i32) -> (i32, i32) {
    %c0_i32 = arith.constant 0 : i32
    %c0_i32_0 = arith.constant 0 : i32
    return %arg0, %c0_i32 : i32, i32
  }
}

</mosaic_0001>

<bundles_post_ra>
// kernel: tpu_custom_call.1
= control target key start
LH: loop header
LB: loop body
LE: loop exit
PB: predicated region body
PF: predicated region fallthrough
CT: control target
= control target key end

     0   :  { %s2596_s0 = inlined_call_operand.vmem [shape: f32[200,16], index: 0, kind: input, shape index: {}]   ;;  %s2597_s1 = inlined_call_operand.vmem [shape: f32[16,32], index: 1, kind: input, shape index: {}]   ;;  %s2598_s2 = inlined_call_operand.vmem [shape: f32[1,32], index: 2, kind: input, shape index: {}]   ;;  %s2599_s3 = inlined_call_operand.vmem [shape: f32[32,32], index: 3, kind: input, shape index: {}]   ;;  %s2600_s4 = inlined_call_operand.vmem [shape: f32[1,32], index: 4, kind: input, shape index: {}]   ;;  %s2601_s5 = inlined_call_operand.vmem [shape: f32[32,16], index: 5, kind: input, shape index: {}]   ;;  %s2602_s6 = inlined_call_operand.vmem [shape: f32[1,16], index: 6, kind: input, shape index: {}]   ;;  %s2603_s7 = inlined_call_operand.vmem [shape: f32[16,1], index: 7, kind: input, shape index: {}]   ;;  %s2604_s8 = inlined_call_operand.<no memory space> [shape: f32[1,1], index: 8, kind: input, shape index: {}]   ;;  %s2605_s9 = inlined_call_operand.vmem [shape: f32[200,1], index: 9, kind: output, shape index: {}]  }
   0x1   :  { %v14_v0 = vstv %s2604_s8 }
   0x2   :  { %15 = vst [vmem:[#allocation2] sm:$0x1] %v14_v0 }
   0x3   :  { %s2239_s11 = smov 0   ;;  %s2241_s12 = smov 0  }
   0x4   :  { %s2243_s13 = smov 0  }
   0x5 LB: > { %s2252_s8 = sadd.s32 4294967295, %s2152_s13   ;;  %s2254_s14 = sadd.s32 1, %s2152_s13   ;;  %s2152_s13 = sphi %s2243_s13, %s2614_s13   ;;  %s2148_s12 = sphi %s2241_s12, %s2613_s12   ;;  %s2144_s11 = sphi %s2239_s11, %s2612_s11  }
   0x6   : > { %s219_s15 = ssub.s32 %s2152_s13, %s2254_s14  ;;  %s222_s16 = sadd.s32 1, %s2148_s12 }
   0x7   : > { %p220_p0 = scmp.eq.s32.totalorder %s219_s15, 0  ;;  %p232_p1 = scmp.ne.s32.totalorder %s2148_s12, %s2144_s11 }
   0x8   : > { %p233_p2 = scmp.eq.s32.totalorder %s2252_s8, 1  ;;  %p1678_p3 = scmp.ge.s32.totalorder %s2152_s13, 1 }
   0x9   : > { %s2262_s17 = scalar_select %p220_p0, %s2148_s12, %s222_s16  }
   0xa   : > { %p2264_p4 = por %p233_p2, %p232_p1  ;;  %p298_p5 = scmp.lt.s32.totalorder %s2152_s13, 3 }
   0xc   : > { %p299_p6 = pnand %p1678_p3, %p298_p5 }
   0xd   : > { %s2275_s23 = sshll.u32 (!%p299_p6), %s2252_s8, 4 }
   0xe   : > { %302 = sbr.rel (%p299_p6) target bundleno = 807 (0x327), region = 56  ;;  %p342_p7 = scmp.lt.s32.totalorder (!%p299_p6), %s2275_s23, 24 }
  0x13   : > { %v373_v1 = vld [vmem:[%s2597_s1 + $0x8] sm:$0xff]  ;;  %v372_v2 = vld [vmem:[%s2597_s1] sm:$0xff]  ;;  %s343_s24 = scalar_select %p342_p7, %s2275_s23, 24  ;;  %vm378_vm0 = vcmask 130048   ;;  %v671_v19 = vld [vmem:[%s2599_s3 + $0x18] sm:$0xff]  ;;  %vm676_vm1 = vcmask 261120  }
  0x14   : > { %441 = vmatpush.msra.mxu0 %v373_v1  ;;  %737 = vmatpush.msra.mxu1 %v671_v19  ;;  %v670_v20 = vld [vmem:[%s2599_s3 + $0x10] sm:$0xff]  ;;  %v2325_v21 = vld [vmem:[%s2598_s2] ss:$0 sm:$0xff]  ;;  %v669_v22 = vld [vmem:[%s2599_s3 + $0x8] sm:$0xff]  ;;  %vm1382_vm2 = vcmask 7168  }
  0x15   : > { %s1681_s25 = sshll.u32 %s343_s24, 3  ;;  %v668_v23 = vld [vmem:[%s2599_s3] sm:$0xff] }
  0x16   : > { %442 = vmatpush.msra.mxu0 %v372_v2  ;;  %s2282_s28 = scalar_lea.vmem %s2596_s0, %s1681_s25  ;;  %738 = vmatpush.msra.mxu1 %v670_v20  ;;  %s334_s25 = sand.u32 1, %s2144_s11  }
  0x17   : > { %v356_v3 = vld [vmem:[%s2282_s28] sm:$0xff]  ;;  %v357_v4 = vld [vmem:[%s2282_s28 + $0x8] sm:$0xff]  ;;  %v358_v5 = vld [vmem:[%s2282_s28 + $0x10] sm:$0xff]  ;;  %s1679_s26 = sshll.u32 %s334_s25, 7  ;;  %s1407_s11 = ssub.s32 (%p2264_p4), 25, %s2275_s23 }
  0x18   : > { %1682 = vmatmul.msk.f32.vlgmr.msra.gmra.mxu0 %vm378_vm0, %v356_v3  ;;  %v359_v6 = vld [vmem:[%s2282_s28 + $0x18] sm:$0xff]  ;;  %v360_v7 = vld [vmem:[%s2282_s28 + $0x20] sm:$0xff]  ;;  %v361_v8 = vld [vmem:[%s2282_s28 + $0x28] sm:$0xff]  ;;  %739 = vmatpush.msra.mxu1 %v669_v22  ;;  %s2458_s27 = scalar_lea.vmem [#allocation3], %s1679_s26   ;;  %p1408_p8 = scmp.lt.s32.totalorder (%p2264_p4), %s1407_s11, 16 }
  0x19   : > { %v362_v9 = vld [vmem:[%s2282_s28 + $0x30] sm:$0xff]  ;;  %v363_v10 = vld [vmem:[%s2282_s28 + $0x38] sm:$0xff]  ;;  %v364_v11 = vld [vmem:[%s2282_s28 + $0x40] sm:$0xff] }
  0x1a   : > { %v365_v12 = vld [vmem:[%s2282_s28 + $0x48] sm:$0xff]  ;;  %v366_v13 = vld [vmem:[%s2282_s28 + $0x50] sm:$0xff]  ;;  %v367_v14 = vld [vmem:[%s2282_s28 + $0x58] sm:$0xff]  ;;  %740 = vmatpush.msra.mxu1 %v668_v23 }
  0x1b   : > { %v368_v15 = vld [vmem:[%s2282_s28 + $0x60] sm:$0xff]  ;;  %v369_v16 = vld [vmem:[%s2282_s28 + $0x68] sm:$0xff]  ;;  %v370_v17 = vld [vmem:[%s2282_s28 + $0x70] sm:$0xff] }
  0x1c   : > { %v371_v18 = vld [vmem:[%s2282_s28 + $0x78] sm:$0xff]  ;;  %s1811_s28 = sshll.u32 (%p2264_p4), %s2252_s8, 7 }
  0x1d   : > { %s2499_s10 = scalar_lea.vmem (%p2264_p4), %s2605_s9, %s1811_s28  }
  0x20   : > { %1683 = vmatmul.msk.f32.gmra.mxu0 %vm378_vm0, %v357_v4 }
  0x28   : > { %1684 = vmatmul.msk.f32.gmra.mxu0 %vm378_vm0, %v358_v5 }
  0x30   : > { %1685 = vmatmul.msk.f32.gmra.mxu0 %vm378_vm0, %v359_v6 }
  0x38   : > { %1686 = vmatmul.msk.f32.gmra.mxu0 %vm378_vm0, %v360_v7 }
  0x40   : > { %1687 = vmatmul.msk.f32.gmra.mxu0 %vm378_vm0, %v361_v8 }
  0x48   : > { %1688 = vmatmul.msk.f32.gmra.mxu0 %vm378_vm0, %v362_v9 }
  0x50   : > { %1689 = vmatmul.msk.f32.gmra.mxu0 %vm378_vm0, %v363_v10 }
  0x58   : > { %1690 = vmatmul.msk.f32.gmra.mxu0 %vm378_vm0, %v364_v11 }
  0x60   : > { %1691 = vmatmul.msk.f32.gmra.mxu0 %vm378_vm0, %v365_v12 }
  0x68   : > { %1692 = vmatmul.msk.f32.gmra.mxu0 %vm378_vm0, %v366_v13 }
  0x70   : > { %1693 = vmatmul.msk.f32.gmra.mxu0 %vm378_vm0, %v367_v14 }
  0x78   : > { %1694 = vmatmul.msk.f32.gmra.mxu0 %vm378_vm0, %v368_v15 }
  0x80   : > { %1695 = vmatmul.msk.f32.gmra.mxu0 %vm378_vm0, %v369_v16 }
  0x88   : > { %1696 = vmatmul.msk.f32.gmra.mxu0 %vm378_vm0, %v370_v17 }
  0x90   : > { %1697 = vmatmul.msk.f32.gmra.mxu0 %vm378_vm0, %v371_v18 }
  0x95   : > { %v444_v24 = vpop.f32.mrf.mxu0 }
  0x96   : > { %v445_v25 = vadd.f32 %v2325_v21, %v444_v24 }
  0x98   : > { %v492_v26 = vmin.f32 %v445_v25, 20.0 }
  0x9a   : > { %v508_v27 = vmul.f32 1.442695, %v492_v26 }
  0x9c   : > { %1906 = vpow2.f32 %v508_v27 }
  0x9d   : > { %v447_v28 = vpop.f32.mrf.mxu0 }
  0x9e   : > { %v448_v29 = vadd.f32 %v2325_v21, %v447_v28 }
  0xa0   : > { %v493_v30 = vmin.f32 %v448_v29, 20.0 }
  0xa2   : > { %v1907_v31 = vpop.eup %1906  ;;  %v510_v32 = vmul.f32 1.442695, %v493_v30 }
  0xa3   : > { %v540_v33 = vadd.f32 1.0, %v1907_v31 }
  0xa4   : > { %1908 = vpow2.f32 %v510_v32 }
  0xa5   : > { %v556_v34 = vmul.f32 %v540_v33, %v540_v33  ;;  %v450_v35 = vpop.f32.mrf.mxu0 }
  0xa6   : > { %v451_v36 = vadd.f32 %v2325_v21, %v450_v35 }
  0xa7   : > { %v588_v37 = vadd.f32 1.0, %v556_v34  ;;  %v1698_v44 = vadd.f32 -1.0, %v556_v34 }
  0xa8   : > { %v494_v38 = vmin.f32 %v451_v36, 20.0 }
  0xa9   : > { %1910 = vrcp.f32 %v588_v37 }
  0xaa   : > { %v1909_v39 = vpop.eup %1908  ;;  %v512_v40 = vmul.f32 1.442695, %v494_v38 }
  0xab   : > { %v541_v41 = vadd.f32 1.0, %v1909_v39 }
  0xac   : > { %1912 = vpow2.f32 %v512_v40 }
  0xad   : > { %v557_v42 = vmul.f32 %v541_v41, %v541_v41  ;;  %v453_v43 = vpop.f32.mrf.mxu0 }
  0xae   : > { %v454_v45 = vadd.f32 %v2325_v21, %v453_v43 }
  0xaf   : > { %v1911_v46 = vpop.eup %1910  ;;  %v589_v47 = vadd.f32 1.0, %v557_v42  ;;  %v1699_v57 = vadd.f32 -1.0, %v557_v42 }
  0xb0   : > { %v620_v48 = vmul.f32 %v1911_v46, %v1698_v44  ;;  %v495_v49 = vmin.f32 %v454_v45, 20.0 }
  0xb1   : > { %1914 = vrcp.f32 %v589_v47 }
  0xb2   : > { %v1913_v50 = vpop.eup %1912  ;;  %v636_v51 = vmul.f32 %v620_v48, %v445_v25  ;;  %v514_v52 = vmul.f32 1.442695, %v495_v49 }
  0xb3   : > { %v542_v53 = vadd.f32 1.0, %v1913_v50 }
  0xb4   : > { %v652_v54 = vmin.f32 %v636_v51, 6.0  ;;  %1916 = vpow2.f32 %v514_v52 }
  0xb5   : > { %v558_v55 = vmul.f32 %v542_v53, %v542_v53  ;;  %v456_v56 = vpop.f32.mrf.mxu0 }
  0xb6   : > { %v457_v58 = vadd.f32 %v2325_v21, %v456_v56  ;;  %1714 = vmatmul.msk.f32.vlgmr.msra.gmra.mxu1 %vm676_vm1, %v652_v54 }
  0xb7   : > { %v1915_v59 = vpop.eup %1914  ;;  %v590_v60 = vadd.f32 1.0, %v558_v55  ;;  %v1700_v6 = vadd.f32 -1.0, %v558_v55 }
  0xb8   : > { %v621_v61 = vmul.f32 %v1915_v59, %v1699_v57  ;;  %v496_v62 = vmin.f32 %v457_v58, 20.0 }
  0xb9   : > { %1918 = vrcp.f32 %v590_v60 }
  0xba   : > { %v1917_v63 = vpop.eup %1916  ;;  %v637_v0 = vmul.f32 %v621_v61, %v448_v29  ;;  %v516_v1 = vmul.f32 1.442695, %v496_v62 }
  0xbb   : > { %v543_v2 = vadd.f32 1.0, %v1917_v63 }
  0xbc   : > { %v653_v3 = vmin.f32 %v637_v0, 6.0  ;;  %1920 = vpow2.f32 %v516_v1 }
  0xbd   : > { %v559_v4 = vmul.f32 %v543_v2, %v543_v2  ;;  %v459_v5 = vpop.f32.mrf.mxu0 }
  0xbe   : > { %v460_v7 = vadd.f32 %v2325_v21, %v459_v5  ;;  %1715 = vmatmul.msk.f32.gmra.mxu1 %vm676_vm1, %v653_v3 }
  0xbf   : > { %v1919_v8 = vpop.eup %1918  ;;  %v591_v9 = vadd.f32 1.0, %v559_v4  ;;  %v1701_v19 = vadd.f32 -1.0, %v559_v4 }
  0xc0   : > { %v622_v10 = vmul.f32 %v1919_v8, %v1700_v6  ;;  %v497_v11 = vmin.f32 %v460_v7, 20.0 }
  0xc1   : > { %1922 = vrcp.f32 %v591_v9 }
  0xc2   : > { %v1921_v12 = vpop.eup %1920  ;;  %v638_v13 = vmul.f32 %v622_v10, %v451_v36  ;;  %v518_v14 = vmul.f32 1.442695, %v497_v11 }
  0xc3   : > { %v544_v15 = vadd.f32 1.0, %v1921_v12 }
  0xc4   : > { %v654_v16 = vmin.f32 %v638_v13, 6.0  ;;  %1924 = vpow2.f32 %v518_v14 }
  0xc5   : > { %v560_v17 = vmul.f32 %v544_v15, %v544_v15  ;;  %v462_v18 = vpop.f32.mrf.mxu0 }
  0xc6   : > { %v463_v20 = vadd.f32 %v2325_v21, %v462_v18  ;;  %1716 = vmatmul.msk.f32.gmra.mxu1 %vm676_vm1, %v654_v16 }
  0xc7   : > { %v1923_v22 = vpop.eup %1922  ;;  %v592_v23 = vadd.f32 1.0, %v560_v17  ;;  %v1702_v33 = vadd.f32 -1.0, %v560_v17 }
  0xc8   : > { %v623_v24 = vmul.f32 %v1923_v22, %v1701_v19  ;;  %v498_v25 = vmin.f32 %v463_v20, 20.0 }
  0xc9   : > { %1926 = vrcp.f32 %v592_v23 }
  0xca   : > { %v1925_v26 = vpop.eup %1924  ;;  %v639_v27 = vmul.f32 %v623_v24, %v454_v45  ;;  %v520_v28 = vmul.f32 1.442695, %v498_v25 }
  0xcb   : > { %v545_v29 = vadd.f32 1.0, %v1925_v26 }
  0xcc   : > { %v655_v30 = vmin.f32 %v639_v27, 6.0  ;;  %1928 = vpow2.f32 %v520_v28 }
  0xcd   : > { %v561_v31 = vmul.f32 %v545_v29, %v545_v29  ;;  %v465_v32 = vpop.f32.mrf.mxu0 }
  0xce   : > { %v466_v34 = vadd.f32 %v2325_v21, %v465_v32  ;;  %1717 = vmatmul.msk.f32.gmra.mxu1 %vm676_vm1, %v655_v30 }
  0xcf   : > { %v1927_v35 = vpop.eup %1926  ;;  %v593_v36 = vadd.f32 1.0, %v561_v31  ;;  %v1703_v46 = vadd.f32 -1.0, %v561_v31 }
  0xd0   : > { %v624_v37 = vmul.f32 %v1927_v35, %v1702_v33  ;;  %v499_v38 = vmin.f32 %v466_v34, 20.0 }
  0xd1   : > { %1930 = vrcp.f32 %v593_v36 }
  0xd2   : > { %v1929_v39 = vpop.eup %1928  ;;  %v640_v40 = vmul.f32 %v624_v37, %v457_v58  ;;  %v522_v41 = vmul.f32 1.442695, %v499_v38 }
  0xd3   : > { %v546_v42 = vadd.f32 1.0, %v1929_v39 }
  0xd4   : > { %v656_v43 = vmin.f32 %v640_v40, 6.0  ;;  %1932 = vpow2.f32 %v522_v41 }
  0xd5   : > { %v562_v44 = vmul.f32 %v546_v42, %v546_v42  ;;  %v468_v45 = vpop.f32.mrf.mxu0 }
  0xd6   : > { %v469_v47 = vadd.f32 %v2325_v21, %v468_v45  ;;  %1718 = vmatmul.msk.f32.gmra.mxu1 %vm676_vm1, %v656_v43 }
  0xd7   : > { %v1931_v48 = vpop.eup %1930  ;;  %v594_v49 = vadd.f32 1.0, %v562_v44  ;;  %v1704_v59 = vadd.f32 -1.0, %v562_v44 }
  0xd8   : > { %v625_v50 = vmul.f32 %v1931_v48, %v1703_v46  ;;  %v500_v51 = vmin.f32 %v469_v47, 20.0 }
  0xd9   : > { %1934 = vrcp.f32 %v594_v49 }
  0xda   : > { %v1933_v52 = vpop.eup %1932  ;;  %v641_v53 = vmul.f32 %v625_v50, %v460_v7  ;;  %v524_v54 = vmul.f32 1.442695, %v500_v51 }
  0xdb   : > { %v547_v55 = vadd.f32 1.0, %v1933_v52 }
  0xdc   : > { %v657_v56 = vmin.f32 %v641_v53, 6.0  ;;  %1936 = vpow2.f32 %v524_v54 }
  0xdd   : > { %v563_v57 = vmul.f32 %v547_v55, %v547_v55  ;;  %v471_v58 = vpop.f32.mrf.mxu0 }
  0xde   : > { %v472_v60 = vadd.f32 %v2325_v21, %v471_v58  ;;  %1719 = vmatmul.msk.f32.gmra.mxu1 %vm676_vm1, %v657_v56 }
  0xdf   : > { %v1935_v61 = vpop.eup %1934  ;;  %v595_v62 = vadd.f32 1.0, %v563_v57  ;;  %v1705_v8 = vadd.f32 -1.0, %v563_v57 }
  0xe0   : > { %v626_v63 = vmul.f32 %v1935_v61, %v1704_v59  ;;  %v501_v0 = vmin.f32 %v472_v60, 20.0 }
  0xe1   : > { %1938 = vrcp.f32 %v595_v62 }
  0xe2   : > { %v1937_v1 = vpop.eup %1936  ;;  %v642_v2 = vmul.f32 %v626_v63, %v463_v20  ;;  %v526_v3 = vmul.f32 1.442695, %v501_v0 }
  0xe3   : > { %v548_v4 = vadd.f32 1.0, %v1937_v1 }
  0xe4   : > { %v658_v5 = vmin.f32 %v642_v2, 6.0  ;;  %1940 = vpow2.f32 %v526_v3 }
  0xe5   : > { %v564_v6 = vmul.f32 %v548_v4, %v548_v4  ;;  %v474_v7 = vpop.f32.mrf.mxu0 }
  0xe6   : > { %v475_v9 = vadd.f32 %v2325_v21, %v474_v7  ;;  %1720 = vmatmul.msk.f32.gmra.mxu1 %vm676_vm1, %v658_v5 }
  0xe7   : > { %v1939_v10 = vpop.eup %1938  ;;  %v596_v11 = vadd.f32 1.0, %v564_v6  ;;  %v1706_v22 = vadd.f32 -1.0, %v564_v6 }
  0xe8   : > { %v627_v12 = vmul.f32 %v1939_v10, %v1705_v8  ;;  %v502_v13 = vmin.f32 %v475_v9, 20.0 }
  0xe9   : > { %1942 = vrcp.f32 %v596_v11 }
  0xea   : > { %v1941_v14 = vpop.eup %1940  ;;  %v643_v15 = vmul.f32 %v627_v12, %v466_v34  ;;  %v528_v16 = vmul.f32 1.442695, %v502_v13 }
  0xeb   : > { %v549_v17 = vadd.f32 1.0, %v1941_v14 }
  0xec   : > { %v659_v18 = vmin.f32 %v643_v15, 6.0  ;;  %1944 = vpow2.f32 %v528_v16 }
  0xed   : > { %v565_v19 = vmul.f32 %v549_v17, %v549_v17  ;;  %v477_v20 = vpop.f32.mrf.mxu0 }
  0xee   : > { %v478_v23 = vadd.f32 %v2325_v21, %v477_v20  ;;  %1721 = vmatmul.msk.f32.gmra.mxu1 %vm676_vm1, %v659_v18 }
  0xef   : > { %v1943_v24 = vpop.eup %1942  ;;  %v597_v25 = vadd.f32 1.0, %v565_v19  ;;  %v1707_v35 = vadd.f32 -1.0, %v565_v19 }
  0xf0   : > { %v628_v26 = vmul.f32 %v1943_v24, %v1706_v22  ;;  %v503_v27 = vmin.f32 %v478_v23, 20.0 }
  0xf1   : > { %1946 = vrcp.f32 %v597_v25 }
  0xf2   : > { %v1945_v28 = vpop.eup %1944  ;;  %v644_v29 = vmul.f32 %v628_v26, %v469_v47  ;;  %v530_v30 = vmul.f32 1.442695, %v503_v27 }
  0xf3   : > { %v550_v31 = vadd.f32 1.0, %v1945_v28 }
  0xf4   : > { %v660_v32 = vmin.f32 %v644_v29, 6.0  ;;  %1948 = vpow2.f32 %v530_v30 }
  0xf5   : > { %v566_v33 = vmul.f32 %v550_v31, %v550_v31  ;;  %v480_v34 = vpop.f32.mrf.mxu0 }
  0xf6   : > { %v481_v36 = vadd.f32 %v2325_v21, %v480_v34  ;;  %1722 = vmatmul.msk.f32.gmra.mxu1 %vm676_vm1, %v660_v32 }
  0xf7   : > { %v1947_v37 = vpop.eup %1946  ;;  %v598_v38 = vadd.f32 1.0, %v566_v33  ;;  %v1708_v48 = vadd.f32 -1.0, %v566_v33 }
  0xf8   : > { %v629_v39 = vmul.f32 %v1947_v37, %v1707_v35  ;;  %v504_v40 = vmin.f32 %v481_v36, 20.0 }
  0xf9   : > { %1950 = vrcp.f32 %v598_v38 }
  0xfa   : > { %v1949_v41 = vpop.eup %1948  ;;  %v645_v42 = vmul.f32 %v629_v39, %v472_v60  ;;  %v532_v43 = vmul.f32 1.442695, %v504_v40 }
  0xfb   : > { %v551_v44 = vadd.f32 1.0, %v1949_v41 }
  0xfc   : > { %v661_v45 = vmin.f32 %v645_v42, 6.0  ;;  %1952 = vpow2.f32 %v532_v43  ;;  %v969_v42 = vld [vmem:[%s2601_s5 + $0x18] sm:$0xff]  ;;  %v968_v43 = vld [vmem:[%s2601_s5 + $0x10] sm:$0xff] }
  0xfd   : > { %v567_v46 = vmul.f32 %v551_v44, %v551_v44  ;;  %v483_v47 = vpop.f32.mrf.mxu0  ;;  %1034 = vmatpush.msra.mxu2 %v969_v42  ;;  %v2374_v44 = vld [vmem:[%s2600_s4] ss:$0 sm:$0xff] }
  0xfe   : > { %v484_v49 = vadd.f32 %v2325_v21, %v483_v47  ;;  %1723 = vmatmul.msk.f32.gmra.mxu1 %vm676_vm1, %v661_v45  ;;  %v967_v45 = vld [vmem:[%s2601_s5 + $0x8] sm:$0xff] }
  0xff   : > { %v1951_v50 = vpop.eup %1950  ;;  %v599_v51 = vadd.f32 1.0, %v567_v46  ;;  %v1709_v61 = vadd.f32 -1.0, %v567_v46  ;;  %1035 = vmatpush.msra.mxu2 %v968_v43  ;;  %v966_v46 = vld [vmem:[%s2601_s5] sm:$0xff] }
 0x100   : > { %v630_v52 = vmul.f32 %v1951_v50, %v1708_v48  ;;  %v505_v53 = vmin.f32 %v484_v49, 20.0 }
 0x101   : > { %1954 = vrcp.f32 %v599_v51  ;;  %1036 = vmatpush.msra.mxu2 %v967_v45 }
 0x102   : > { %v1953_v54 = vpop.eup %1952  ;;  %v646_v55 = vmul.f32 %v630_v52, %v475_v9  ;;  %v534_v56 = vmul.f32 1.442695, %v505_v53 }
 0x103   : > { %v552_v57 = vadd.f32 1.0, %v1953_v54  ;;  %1037 = vmatpush.msra.mxu2 %v966_v46 }
 0x104   : > { %v662_v58 = vmin.f32 %v646_v55, 6.0  ;;  %1956 = vpow2.f32 %v534_v56 }
 0x105   : > { %v568_v59 = vmul.f32 %v552_v57, %v552_v57  ;;  %v486_v60 = vpop.f32.mrf.mxu0 }
 0x106   : > { %v487_v62 = vadd.f32 %v2325_v21, %v486_v60  ;;  %1724 = vmatmul.msk.f32.gmra.mxu1 %vm676_vm1, %v662_v58 }
 0x107   : > { %v1955_v63 = vpop.eup %1954  ;;  %v600_v0 = vadd.f32 1.0, %v568_v59  ;;  %v1710_v10 = vadd.f32 -1.0, %v568_v59 }
 0x108   : > { %v631_v1 = vmul.f32 %v1955_v63, %v1709_v61  ;;  %v506_v2 = vmin.f32 %v487_v62, 20.0 }
 0x109   : > { %1958 = vrcp.f32 %v600_v0 }
 0x10a   : > { %v1957_v3 = vpop.eup %1956  ;;  %v647_v4 = vmul.f32 %v631_v1, %v478_v23  ;;  %v536_v5 = vmul.f32 1.442695, %v506_v2 }
 0x10b   : > { %v553_v6 = vadd.f32 1.0, %v1957_v3 }
 0x10c   : > { %v663_v7 = vmin.f32 %v647_v4, 6.0  ;;  %1960 = vpow2.f32 %v536_v5 }
 0x10d   : > { %v569_v8 = vmul.f32 %v553_v6, %v553_v6  ;;  %v489_v9 = vpop.f32.mrf.mxu0 }
 0x10e   : > { %v490_v11 = vadd.f32 %v2325_v21, %v489_v9  ;;  %1725 = vmatmul.msk.f32.gmra.mxu1 %vm676_vm1, %v663_v7 }
 0x10f   : > { %v1959_v12 = vpop.eup %1958  ;;  %v601_v13 = vadd.f32 1.0, %v569_v8  ;;  %v1711_v23 = vadd.f32 -1.0, %v569_v8 }
 0x110   : > { %v632_v14 = vmul.f32 %v1959_v12, %v1710_v10  ;;  %v507_v15 = vmin.f32 %v490_v11, 20.0 }
 0x111   : > { %1962 = vrcp.f32 %v601_v13 }
 0x112   : > { %v1961_v16 = vpop.eup %1960  ;;  %v648_v17 = vmul.f32 %v632_v14, %v481_v36  ;;  %v538_v18 = vmul.f32 1.442695, %v507_v15 }
 0x113   : > { %v554_v19 = vadd.f32 1.0, %v1961_v16 }
 0x114   : > { %v664_v20 = vmin.f32 %v648_v17, 6.0  ;;  %1964 = vpow2.f32 %v538_v18 }
 0x115   : > { %v570_v22 = vmul.f32 %v554_v19, %v554_v19 }
 0x116   : > { %1726 = vmatmul.msk.f32.gmra.mxu1 %vm676_vm1, %v664_v20 }
 0x117   : > { %v1963_v24 = vpop.eup %1962  ;;  %v602_v25 = vadd.f32 1.0, %v570_v22  ;;  %v1712_v31 = vadd.f32 -1.0, %v570_v22 }
 0x118   : > { %v633_v21 = vmul.f32 %v1963_v24, %v1711_v23 }
 0x119   : > { %1966 = vrcp.f32 %v602_v25 }
 0x11a   : > { %v1965_v26 = vpop.eup %1964  ;;  %v649_v27 = vmul.f32 %v633_v21, %v484_v49 }
 0x11b   : > { %v555_v28 = vadd.f32 1.0, %v1965_v26 }
 0x11c   : > { %v665_v29 = vmin.f32 %v649_v27, 6.0 }
 0x11d   : > { %v571_v30 = vmul.f32 %v555_v28, %v555_v28 }
 0x11e   : > { %1727 = vmatmul.msk.f32.gmra.mxu1 %vm676_vm1, %v665_v29 }
 0x11f   : > { %v1967_v32 = vpop.eup %1966  ;;  %v603_v33 = vadd.f32 1.0, %v571_v30  ;;  %v1713_v37 = vadd.f32 -1.0, %v571_v30 }
 0x120   : > { %v634_v34 = vmul.f32 %v1967_v32, %v1712_v31 }
 0x121   : > { %1968 = vrcp.f32 %v603_v33 }
 0x122   : > { %v650_v35 = vmul.f32 %v634_v34, %v487_v62 }
 0x124   : > { %v666_v36 = vmin.f32 %v650_v35, 6.0 }
 0x126   : > { %1728 = vmatmul.msk.f32.gmra.mxu1 %vm676_vm1, %v666_v36 }
 0x127   : > { %v1969_v38 = vpop.eup %1968 }
 0x128   : > { %v635_v39 = vmul.f32 %v1969_v38, %v1713_v37 }
 0x12a   : > { %v651_v40 = vmul.f32 %v635_v39, %v490_v11 }
 0x12c   : > { %v667_v41 = vmin.f32 %v651_v40, 6.0 }
 0x12e   : > { %1729 = vmatmul.msk.f32.gmra.mxu1 %vm676_vm1, %v667_v41 }
 0x133   : > { %v742_v47 = vpop.f32.mrf.mxu1 }
 0x134   : > { %v743_v48 = vadd.f32 %v2374_v44, %v742_v47 }
 0x136   : > { %v790_v49 = vmin.f32 %v743_v48, 20.0 }
 0x138   : > { %v806_v50 = vmul.f32 1.442695, %v790_v49 }
 0x13a   : > { %1970 = vpow2.f32 %v806_v50 }
 0x13b   : > { %v745_v51 = vpop.f32.mrf.mxu1 }
 0x13c   : > { %v746_v52 = vadd.f32 %v2374_v44, %v745_v51 }
 0x13e   : > { %v791_v53 = vmin.f32 %v746_v52, 20.0 }
 0x140   : > { %v1971_v54 = vpop.eup %1970  ;;  %v808_v55 = vmul.f32 1.442695, %v791_v53 }
 0x141   : > { %v838_v56 = vadd.f32 1.0, %v1971_v54 }
 0x142   : > { %1972 = vpow2.f32 %v808_v55 }
 0x143   : > { %v854_v57 = vmul.f32 %v838_v56, %v838_v56  ;;  %v748_v58 = vpop.f32.mrf.mxu1 }
 0x144   : > { %v749_v59 = vadd.f32 %v2374_v44, %v748_v58 }
 0x145   : > { %v886_v60 = vadd.f32 1.0, %v854_v57  ;;  %v1730_v3 = vadd.f32 -1.0, %v854_v57 }
 0x146   : > { %v792_v61 = vmin.f32 %v749_v59, 20.0 }
 0x147   : > { %1974 = vrcp.f32 %v886_v60 }
 0x148   : > { %v1973_v62 = vpop.eup %1972  ;;  %v810_v63 = vmul.f32 1.442695, %v792_v61 }
 0x149   : > { %v839_v0 = vadd.f32 1.0, %v1973_v62 }
 0x14a   : > { %1976 = vpow2.f32 %v810_v63 }
 0x14b   : > { %v855_v1 = vmul.f32 %v839_v0, %v839_v0  ;;  %v751_v2 = vpop.f32.mrf.mxu1 }
 0x14c   : > { %v752_v4 = vadd.f32 %v2374_v44, %v751_v2 }
 0x14d   : > { %v1975_v5 = vpop.eup %1974  ;;  %v887_v6 = vadd.f32 1.0, %v855_v1  ;;  %v1731_v16 = vadd.f32 -1.0, %v855_v1 }
 0x14e   : > { %v918_v7 = vmul.f32 %v1975_v5, %v1730_v3  ;;  %v793_v8 = vmin.f32 %v752_v4, 20.0 }
 0x14f   : > { %1978 = vrcp.f32 %v887_v6 }
 0x150   : > { %v1977_v9 = vpop.eup %1976  ;;  %v934_v10 = vmul.f32 %v918_v7, %v743_v48  ;;  %v812_v11 = vmul.f32 1.442695, %v793_v8 }
 0x151   : > { %v840_v12 = vadd.f32 1.0, %v1977_v9 }
 0x152   : > { %v950_v13 = vmin.f32 %v934_v10, 6.0  ;;  %1980 = vpow2.f32 %v812_v11 }
 0x153   : > { %v856_v14 = vmul.f32 %v840_v12, %v840_v12  ;;  %v754_v15 = vpop.f32.mrf.mxu1 }
 0x154   : > { %v755_v17 = vadd.f32 %v2374_v44, %v754_v15  ;;  %1746 = vmatmul.msk.f32.vlgmr.msra.gmra.mxu2 %vm676_vm1, %v950_v13 }
 0x155   : > { %v1979_v18 = vpop.eup %1978  ;;  %v888_v19 = vadd.f32 1.0, %v856_v14  ;;  %v1732_v29 = vadd.f32 -1.0, %v856_v14 }
 0x156   : > { %v919_v20 = vmul.f32 %v1979_v18, %v1731_v16  ;;  %v794_v22 = vmin.f32 %v755_v17, 20.0 }
 0x157   : > { %1982 = vrcp.f32 %v888_v19 }
 0x158   : > { %v1981_v23 = vpop.eup %1980  ;;  %v935_v24 = vmul.f32 %v919_v20, %v746_v52  ;;  %v814_v25 = vmul.f32 1.442695, %v794_v22 }
 0x159   : > { %v841_v21 = vadd.f32 1.0, %v1981_v23 }
 0x15a   : > { %v951_v26 = vmin.f32 %v935_v24, 6.0  ;;  %1984 = vpow2.f32 %v814_v25 }
 0x15b   : > { %v857_v27 = vmul.f32 %v841_v21, %v841_v21  ;;  %v757_v28 = vpop.f32.mrf.mxu1 }
 0x15c   : > { %v758_v30 = vadd.f32 %v2374_v44, %v757_v28  ;;  %1747 = vmatmul.msk.f32.gmra.mxu2 %vm676_vm1, %v951_v26 }
 0x15d   : > { %v1983_v31 = vpop.eup %1982  ;;  %v889_v32 = vadd.f32 1.0, %v857_v27  ;;  %v1733_v42 = vadd.f32 -1.0, %v857_v27 }
 0x15e   : > { %v920_v33 = vmul.f32 %v1983_v31, %v1732_v29  ;;  %v795_v34 = vmin.f32 %v758_v30, 20.0 }
 0x15f   : > { %1986 = vrcp.f32 %v889_v32 }
 0x160   : > { %v1985_v35 = vpop.eup %1984  ;;  %v936_v36 = vmul.f32 %v920_v33, %v749_v59  ;;  %v816_v37 = vmul.f32 1.442695, %v795_v34 }
 0x161   : > { %v842_v38 = vadd.f32 1.0, %v1985_v35 }
 0x162   : > { %v952_v39 = vmin.f32 %v936_v36, 6.0  ;;  %1988 = vpow2.f32 %v816_v37 }
 0x163   : > { %v858_v40 = vmul.f32 %v842_v38, %v842_v38  ;;  %v760_v41 = vpop.f32.mrf.mxu1 }
 0x164   : > { %v761_v43 = vadd.f32 %v2374_v44, %v760_v41  ;;  %1748 = vmatmul.msk.f32.gmra.mxu2 %vm676_vm1, %v952_v39 }
 0x165   : > { %v1987_v45 = vpop.eup %1986  ;;  %v890_v46 = vadd.f32 1.0, %v858_v40  ;;  %v1734_v56 = vadd.f32 -1.0, %v858_v40 }
 0x166   : > { %v921_v47 = vmul.f32 %v1987_v45, %v1733_v42  ;;  %v796_v48 = vmin.f32 %v761_v43, 20.0 }
 0x167   : > { %1990 = vrcp.f32 %v890_v46 }
 0x168   : > { %v1989_v49 = vpop.eup %1988  ;;  %v937_v50 = vmul.f32 %v921_v47, %v752_v4  ;;  %v818_v51 = vmul.f32 1.442695, %v796_v48 }
 0x169   : > { %v843_v52 = vadd.f32 1.0, %v1989_v49 }
 0x16a   : > { %v953_v53 = vmin.f32 %v937_v50, 6.0  ;;  %1992 = vpow2.f32 %v818_v51 }
 0x16b   : > { %v859_v54 = vmul.f32 %v843_v52, %v843_v52  ;;  %v763_v55 = vpop.f32.mrf.mxu1 }
 0x16c   : > { %v764_v57 = vadd.f32 %v2374_v44, %v763_v55  ;;  %1749 = vmatmul.msk.f32.gmra.mxu2 %vm676_vm1, %v953_v53 }
 0x16d   : > { %v1991_v58 = vpop.eup %1990  ;;  %v891_v59 = vadd.f32 1.0, %v859_v54  ;;  %v1735_v5 = vadd.f32 -1.0, %v859_v54 }
 0x16e   : > { %v922_v60 = vmul.f32 %v1991_v58, %v1734_v56  ;;  %v797_v61 = vmin.f32 %v764_v57, 20.0 }
 0x16f   : > { %1994 = vrcp.f32 %v891_v59 }
 0x170   : > { %v1993_v62 = vpop.eup %1992  ;;  %v938_v63 = vmul.f32 %v922_v60, %v755_v17  ;;  %v820_v0 = vmul.f32 1.442695, %v797_v61 }
 0x171   : > { %v844_v1 = vadd.f32 1.0, %v1993_v62 }
 0x172   : > { %v954_v2 = vmin.f32 %v938_v63, 6.0  ;;  %1996 = vpow2.f32 %v820_v0 }
 0x173   : > { %v860_v3 = vmul.f32 %v844_v1, %v844_v1  ;;  %v766_v4 = vpop.f32.mrf.mxu1 }
 0x174   : > { %v767_v6 = vadd.f32 %v2374_v44, %v766_v4  ;;  %1750 = vmatmul.msk.f32.gmra.mxu2 %vm676_vm1, %v954_v2 }
 0x175   : > { %v1995_v7 = vpop.eup %1994  ;;  %v892_v8 = vadd.f32 1.0, %v860_v3  ;;  %v1736_v18 = vadd.f32 -1.0, %v860_v3 }
 0x176   : > { %v923_v9 = vmul.f32 %v1995_v7, %v1735_v5  ;;  %v798_v10 = vmin.f32 %v767_v6, 20.0 }
 0x177   : > { %1998 = vrcp.f32 %v892_v8 }
 0x178   : > { %v1997_v11 = vpop.eup %1996  ;;  %v939_v12 = vmul.f32 %v923_v9, %v758_v30  ;;  %v822_v13 = vmul.f32 1.442695, %v798_v10 }
 0x179   : > { %v845_v14 = vadd.f32 1.0, %v1997_v11 }
 0x17a   : > { %v955_v15 = vmin.f32 %v939_v12, 6.0  ;;  %2000 = vpow2.f32 %v822_v13 }
 0x17b   : > { %v861_v16 = vmul.f32 %v845_v14, %v845_v14  ;;  %v769_v17 = vpop.f32.mrf.mxu1 }
 0x17c   : > { %v770_v19 = vadd.f32 %v2374_v44, %v769_v17  ;;  %1751 = vmatmul.msk.f32.gmra.mxu2 %vm676_vm1, %v955_v15 }
 0x17d   : > { %v1999_v20 = vpop.eup %1998  ;;  %v893_v22 = vadd.f32 1.0, %v861_v16  ;;  %v1737_v31 = vadd.f32 -1.0, %v861_v16 }
 0x17e   : > { %v924_v23 = vmul.f32 %v1999_v20, %v1736_v18  ;;  %v799_v24 = vmin.f32 %v770_v19, 20.0 }
 0x17f   : > { %2002 = vrcp.f32 %v893_v22 }
 0x180   : > { %v2001_v25 = vpop.eup %2000  ;;  %v940_v21 = vmul.f32 %v924_v23, %v761_v43  ;;  %v824_v26 = vmul.f32 1.442695, %v799_v24 }
 0x181   : > { %v846_v27 = vadd.f32 1.0, %v2001_v25 }
 0x182   : > { %v956_v28 = vmin.f32 %v940_v21, 6.0  ;;  %2004 = vpow2.f32 %v824_v26 }
 0x183   : > { %v862_v29 = vmul.f32 %v846_v27, %v846_v27  ;;  %v772_v30 = vpop.f32.mrf.mxu1 }
 0x184   : > { %v773_v32 = vadd.f32 %v2374_v44, %v772_v30  ;;  %1752 = vmatmul.msk.f32.gmra.mxu2 %vm676_vm1, %v956_v28 }
 0x185   : > { %v2003_v33 = vpop.eup %2002  ;;  %v894_v34 = vadd.f32 1.0, %v862_v29  ;;  %v1738_v45 = vadd.f32 -1.0, %v862_v29 }
 0x186   : > { %v925_v35 = vmul.f32 %v2003_v33, %v1737_v31  ;;  %v800_v36 = vmin.f32 %v773_v32, 20.0 }
 0x187   : > { %2006 = vrcp.f32 %v894_v34 }
 0x188   : > { %v2005_v37 = vpop.eup %2004  ;;  %v941_v38 = vmul.f32 %v925_v35, %v764_v57  ;;  %v826_v39 = vmul.f32 1.442695, %v800_v36 }
 0x189   : > { %v847_v40 = vadd.f32 1.0, %v2005_v37 }
 0x18a   : > { %v957_v41 = vmin.f32 %v941_v38, 6.0  ;;  %2008 = vpow2.f32 %v826_v39 }
 0x18b   : > { %v863_v42 = vmul.f32 %v847_v40, %v847_v40  ;;  %v775_v43 = vpop.f32.mrf.mxu1 }
 0x18c   : > { %v776_v46 = vadd.f32 %v2374_v44, %v775_v43  ;;  %1753 = vmatmul.msk.f32.gmra.mxu2 %vm676_vm1, %v957_v41 }
 0x18d   : > { %v2007_v47 = vpop.eup %2006  ;;  %v895_v48 = vadd.f32 1.0, %v863_v42  ;;  %v1739_v58 = vadd.f32 -1.0, %v863_v42 }
 0x18e   : > { %v926_v49 = vmul.f32 %v2007_v47, %v1738_v45  ;;  %v801_v50 = vmin.f32 %v776_v46, 20.0 }
 0x18f   : > { %2010 = vrcp.f32 %v895_v48 }
 0x190   : > { %v2009_v51 = vpop.eup %2008  ;;  %v942_v52 = vmul.f32 %v926_v49, %v767_v6  ;;  %v828_v53 = vmul.f32 1.442695, %v801_v50 }
 0x191   : > { %v848_v54 = vadd.f32 1.0, %v2009_v51 }
 0x192   : > { %v958_v55 = vmin.f32 %v942_v52, 6.0  ;;  %2012 = vpow2.f32 %v828_v53 }
 0x193   : > { %v864_v56 = vmul.f32 %v848_v54, %v848_v54  ;;  %v778_v57 = vpop.f32.mrf.mxu1 }
 0x194   : > { %v779_v59 = vadd.f32 %v2374_v44, %v778_v57  ;;  %1754 = vmatmul.msk.f32.gmra.mxu2 %vm676_vm1, %v958_v55 }
 0x195   : > { %v2011_v60 = vpop.eup %2010  ;;  %v896_v61 = vadd.f32 1.0, %v864_v56  ;;  %v1740_v7 = vadd.f32 -1.0, %v864_v56 }
 0x196   : > { %v927_v62 = vmul.f32 %v2011_v60, %v1739_v58  ;;  %v802_v63 = vmin.f32 %v779_v59, 20.0 }
 0x197   : > { %2014 = vrcp.f32 %v896_v61 }
 0x198   : > { %v2013_v0 = vpop.eup %2012  ;;  %v943_v1 = vmul.f32 %v927_v62, %v770_v19  ;;  %v830_v2 = vmul.f32 1.442695, %v802_v63 }
 0x199   : > { %v849_v3 = vadd.f32 1.0, %v2013_v0 }
 0x19a   : > { %v959_v4 = vmin.f32 %v943_v1, 6.0  ;;  %2016 = vpow2.f32 %v830_v2  ;;  %v2417_v1 = vld [vmem:[%s2602_s6] ss:$0 sm:$0xff]  ;;  %v1264_v2 = vld [vmem:[%s2603_s7 + $0x8] sm:$0xff] }
 0x19b   : > { %v865_v5 = vmul.f32 %v849_v3, %v849_v3  ;;  %v781_v6 = vpop.f32.mrf.mxu1  ;;  %1331 = vmatpush.msra.mxu3 %v1264_v2  ;;  %v1263_v3 = vld [vmem:[%s2603_s7] sm:$0xff] }
 0x19c   : > { %v782_v8 = vadd.f32 %v2374_v44, %v781_v6  ;;  %1755 = vmatmul.msk.f32.gmra.mxu2 %vm676_vm1, %v959_v4 }
 0x19d   : > { %v2015_v9 = vpop.eup %2014  ;;  %v897_v10 = vadd.f32 1.0, %v865_v5  ;;  %v1741_v20 = vadd.f32 -1.0, %v865_v5  ;;  %1332 = vmatpush.msra.mxu3 %v1263_v3 }
 0x19e   : > { %v928_v11 = vmul.f32 %v2015_v9, %v1740_v7  ;;  %v803_v12 = vmin.f32 %v782_v8, 20.0 }
 0x19f   : > { %2018 = vrcp.f32 %v897_v10 }
 0x1a0   : > { %v2017_v13 = vpop.eup %2016  ;;  %v944_v14 = vmul.f32 %v928_v11, %v773_v32  ;;  %v832_v15 = vmul.f32 1.442695, %v803_v12 }
 0x1a1   : > { %v850_v16 = vadd.f32 1.0, %v2017_v13 }
 0x1a2   : > { %v960_v17 = vmin.f32 %v944_v14, 6.0  ;;  %2020 = vpow2.f32 %v832_v15 }
 0x1a3   : > { %v866_v18 = vmul.f32 %v850_v16, %v850_v16  ;;  %v784_v19 = vpop.f32.mrf.mxu1 }
 0x1a4   : > { %v785_v22 = vadd.f32 %v2374_v44, %v784_v19  ;;  %1756 = vmatmul.msk.f32.gmra.mxu2 %vm676_vm1, %v960_v17 }
 0x1a5   : > { %v2019_v23 = vpop.eup %2018  ;;  %v898_v24 = vadd.f32 1.0, %v866_v18  ;;  %v1742_v33 = vadd.f32 -1.0, %v866_v18 }
 0x1a6   : > { %v929_v25 = vmul.f32 %v2019_v23, %v1741_v20  ;;  %v804_v21 = vmin.f32 %v785_v22, 20.0 }
 0x1a7   : > { %2022 = vrcp.f32 %v898_v24 }
 0x1a8   : > { %v2021_v26 = vpop.eup %2020  ;;  %v945_v27 = vmul.f32 %v929_v25, %v776_v46  ;;  %v834_v28 = vmul.f32 1.442695, %v804_v21 }
 0x1a9   : > { %v851_v29 = vadd.f32 1.0, %v2021_v26 }
 0x1aa   : > { %v961_v30 = vmin.f32 %v945_v27, 6.0  ;;  %2024 = vpow2.f32 %v834_v28 }
 0x1ab   : > { %v867_v31 = vmul.f32 %v851_v29, %v851_v29  ;;  %v787_v32 = vpop.f32.mrf.mxu1 }
 0x1ac   : > { %v788_v34 = vadd.f32 %v2374_v44, %v787_v32  ;;  %1757 = vmatmul.msk.f32.gmra.mxu2 %vm676_vm1, %v961_v30 }
 0x1ad   : > { %v2023_v35 = vpop.eup %2022  ;;  %v899_v36 = vadd.f32 1.0, %v867_v31  ;;  %v1743_v46 = vadd.f32 -1.0, %v867_v31 }
 0x1ae   : > { %v930_v37 = vmul.f32 %v2023_v35, %v1742_v33  ;;  %v805_v38 = vmin.f32 %v788_v34, 20.0 }
 0x1af   : > { %2026 = vrcp.f32 %v899_v36 }
 0x1b0   : > { %v2025_v39 = vpop.eup %2024  ;;  %v946_v40 = vmul.f32 %v930_v37, %v779_v59  ;;  %v836_v41 = vmul.f32 1.442695, %v805_v38 }
 0x1b1   : > { %v852_v42 = vadd.f32 1.0, %v2025_v39 }
 0x1b2   : > { %v962_v43 = vmin.f32 %v946_v40, 6.0  ;;  %2028 = vpow2.f32 %v836_v41 }
 0x1b3   : > { %v868_v45 = vmul.f32 %v852_v42, %v852_v42 }
 0x1b4   : > { %1758 = vmatmul.msk.f32.gmra.mxu2 %vm676_vm1, %v962_v43 }
 0x1b5   : > { %v2027_v47 = vpop.eup %2026  ;;  %v900_v48 = vadd.f32 1.0, %v868_v45  ;;  %v1744_v54 = vadd.f32 -1.0, %v868_v45 }
 0x1b6   : > { %v931_v44 = vmul.f32 %v2027_v47, %v1743_v46 }
 0x1b7   : > { %2030 = vrcp.f32 %v900_v48 }
 0x1b8   : > { %v2029_v49 = vpop.eup %2028  ;;  %v947_v50 = vmul.f32 %v931_v44, %v782_v8 }
 0x1b9   : > { %v853_v51 = vadd.f32 1.0, %v2029_v49 }
 0x1ba   : > { %v963_v52 = vmin.f32 %v947_v50, 6.0 }
 0x1bb   : > { %v869_v53 = vmul.f32 %v853_v51, %v853_v51 }
 0x1bc   : > { %1759 = vmatmul.msk.f32.gmra.mxu2 %vm676_vm1, %v963_v52 }
 0x1bd   : > { %v2031_v55 = vpop.eup %2030  ;;  %v901_v56 = vadd.f32 1.0, %v869_v53  ;;  %v1745_v60 = vadd.f32 -1.0, %v869_v53 }
 0x1be   : > { %v932_v57 = vmul.f32 %v2031_v55, %v1744_v54 }
 0x1bf   : > { %2032 = vrcp.f32 %v901_v56 }
 0x1c0   : > { %v948_v58 = vmul.f32 %v932_v57, %v785_v22 }
 0x1c2   : > { %v964_v59 = vmin.f32 %v948_v58, 6.0 }
 0x1c4   : > { %1760 = vmatmul.msk.f32.gmra.mxu2 %vm676_vm1, %v964_v59 }
 0x1c5   : > { %v2033_v61 = vpop.eup %2032 }
 0x1c6   : > { %v933_v62 = vmul.f32 %v2033_v61, %v1745_v60 }
 0x1c8   : > { %v949_v63 = vmul.f32 %v933_v62, %v788_v34 }
 0x1ca   : > { %v965_v0 = vmin.f32 %v949_v63, 6.0 }
 0x1cc   : > { %1761 = vmatmul.msk.f32.gmra.mxu2 %vm676_vm1, %v965_v0 }
 0x1d7   : > { %v1039_v4 = vpop.f32.mrf.mxu2 }
 0x1d8   : > { %v1040_v5 = vadd.f32 %v2417_v1, %v1039_v4 }
 0x1da   : > { %v1087_v6 = vmin.f32 %v1040_v5, 20.0 }
 0x1dc   : > { %v1103_v7 = vmul.f32 1.442695, %v1087_v6 }
 0x1de   : > { %2034 = vpow2.f32 %v1103_v7 }
 0x1df   : > { %v1042_v8 = vpop.f32.mrf.mxu2 }
 0x1e0   : > { %v1043_v9 = vadd.f32 %v2417_v1, %v1042_v8 }
 0x1e2   : > { %v1088_v10 = vmin.f32 %v1043_v9, 20.0 }
 0x1e4   : > { %v2035_v11 = vpop.eup %2034  ;;  %v1105_v12 = vmul.f32 1.442695, %v1088_v10 }
 0x1e5   : > { %v1135_v13 = vadd.f32 1.0, %v2035_v11 }
 0x1e6   : > { %2036 = vpow2.f32 %v1105_v12 }
 0x1e7   : > { %v1151_v14 = vmul.f32 %v1135_v13, %v1135_v13  ;;  %v1045_v15 = vpop.f32.mrf.mxu2 }
 0x1e8   : > { %v1046_v16 = vadd.f32 %v2417_v1, %v1045_v15 }
 0x1e9   : > { %v1183_v17 = vadd.f32 1.0, %v1151_v14  ;;  %v1762_v25 = vadd.f32 -1.0, %v1151_v14 }
 0x1ea   : > { %v1089_v18 = vmin.f32 %v1046_v16, 20.0 }
 0x1eb   : > { %2038 = vrcp.f32 %v1183_v17 }
 0x1ec   : > { %v2037_v19 = vpop.eup %2036  ;;  %v1107_v20 = vmul.f32 1.442695, %v1089_v18 }
 0x1ed   : > { %v1136_v22 = vadd.f32 1.0, %v2037_v19 }
 0x1ee   : > { %2040 = vpow2.f32 %v1107_v20 }
 0x1ef   : > { %v1152_v23 = vmul.f32 %v1136_v22, %v1136_v22  ;;  %v1048_v24 = vpop.f32.mrf.mxu2 }
 0x1f0   : > { %v1049_v21 = vadd.f32 %v2417_v1, %v1048_v24 }
 0x1f1   : > { %v2039_v26 = vpop.eup %2038  ;;  %v1184_v27 = vadd.f32 1.0, %v1152_v23  ;;  %v1763_v37 = vadd.f32 -1.0, %v1152_v23 }
 0x1f2   : > { %v1215_v28 = vmul.f32 %v2039_v26, %v1762_v25  ;;  %v1090_v29 = vmin.f32 %v1049_v21, 20.0 }
 0x1f3   : > { %2042 = vrcp.f32 %v1184_v27 }
 0x1f4   : > { %v2041_v30 = vpop.eup %2040  ;;  %v1231_v31 = vmul.f32 %v1215_v28, %v1040_v5  ;;  %v1109_v32 = vmul.f32 1.442695, %v1090_v29 }
 0x1f5   : > { %v1137_v33 = vadd.f32 1.0, %v2041_v30 }
 0x1f6   : > { %v1247_v34 = vmin.f32 %v1231_v31, 6.0  ;;  %2044 = vpow2.f32 %v1109_v32 }
 0x1f7   : > { %v1153_v35 = vmul.f32 %v1137_v33, %v1137_v33  ;;  %v1051_v36 = vpop.f32.mrf.mxu2 }
 0x1f8   : > { %v1052_v38 = vadd.f32 %v2417_v1, %v1051_v36  ;;  %1778 = vmatmul.msk.f32.vlgmr.msra.gmra.mxu3 %vm378_vm0, %v1247_v34 }
 0x1f9   : > { %v2043_v39 = vpop.eup %2042  ;;  %v1185_v40 = vadd.f32 1.0, %v1153_v35  ;;  %v1764_v50 = vadd.f32 -1.0, %v1153_v35 }
 0x1fa   : > { %v1216_v41 = vmul.f32 %v2043_v39, %v1763_v37  ;;  %v1091_v42 = vmin.f32 %v1052_v38, 20.0 }
 0x1fb   : > { %2046 = vrcp.f32 %v1185_v40 }
 0x1fc   : > { %v2045_v43 = vpop.eup %2044  ;;  %v1232_v45 = vmul.f32 %v1216_v41, %v1043_v9  ;;  %v1111_v46 = vmul.f32 1.442695, %v1091_v42 }
 0x1fd   : > { %v1138_v47 = vadd.f32 1.0, %v2045_v43 }
 0x1fe   : > { %v1248_v48 = vmin.f32 %v1232_v45, 6.0  ;;  %2048 = vpow2.f32 %v1111_v46 }
 0x1ff   : > { %v1154_v44 = vmul.f32 %v1138_v47, %v1138_v47  ;;  %v1054_v49 = vpop.f32.mrf.mxu2 }
 0x200   : > { %v1055_v51 = vadd.f32 %v2417_v1, %v1054_v49  ;;  %1779 = vmatmul.msk.f32.gmra.mxu3 %vm378_vm0, %v1248_v48 }
 0x201   : > { %v2047_v52 = vpop.eup %2046  ;;  %v1186_v53 = vadd.f32 1.0, %v1154_v44  ;;  %v1765_v63 = vadd.f32 -1.0, %v1154_v44 }
 0x202   : > { %v1217_v54 = vmul.f32 %v2047_v52, %v1764_v50  ;;  %v1092_v55 = vmin.f32 %v1055_v51, 20.0 }
 0x203   : > { %2050 = vrcp.f32 %v1186_v53 }
 0x204   : > { %v2049_v56 = vpop.eup %2048  ;;  %v1233_v57 = vmul.f32 %v1217_v54, %v1046_v16  ;;  %v1113_v58 = vmul.f32 1.442695, %v1092_v55 }
 0x205   : > { %v1139_v59 = vadd.f32 1.0, %v2049_v56 }
 0x206   : > { %v1249_v60 = vmin.f32 %v1233_v57, 6.0  ;;  %2052 = vpow2.f32 %v1113_v58 }
 0x207   : > { %v1155_v61 = vmul.f32 %v1139_v59, %v1139_v59  ;;  %v1057_v62 = vpop.f32.mrf.mxu2 }
 0x208   : > { %v1058_v0 = vadd.f32 %v2417_v1, %v1057_v62  ;;  %1780 = vmatmul.msk.f32.gmra.mxu3 %vm378_vm0, %v1249_v60 }
 0x209   : > { %v2051_v2 = vpop.eup %2050  ;;  %v1187_v3 = vadd.f32 1.0, %v1155_v61  ;;  %v1766_v13 = vadd.f32 -1.0, %v1155_v61 }
 0x20a   : > { %v1218_v4 = vmul.f32 %v2051_v2, %v1765_v63  ;;  %v1093_v5 = vmin.f32 %v1058_v0, 20.0 }
 0x20b   : > { %2054 = vrcp.f32 %v1187_v3 }
 0x20c   : > { %v2053_v6 = vpop.eup %2052  ;;  %v1234_v7 = vmul.f32 %v1218_v4, %v1049_v21  ;;  %v1115_v8 = vmul.f32 1.442695, %v1093_v5 }
 0x20d   : > { %v1140_v9 = vadd.f32 1.0, %v2053_v6 }
 0x20e   : > { %v1250_v10 = vmin.f32 %v1234_v7, 6.0  ;;  %2056 = vpow2.f32 %v1115_v8 }
 0x20f   : > { %v1156_v11 = vmul.f32 %v1140_v9, %v1140_v9  ;;  %v1060_v12 = vpop.f32.mrf.mxu2 }
 0x210   : > { %v1061_v14 = vadd.f32 %v2417_v1, %v1060_v12  ;;  %1781 = vmatmul.msk.f32.gmra.mxu3 %vm378_vm0, %v1250_v10 }
 0x211   : > { %v2055_v15 = vpop.eup %2054  ;;  %v1188_v16 = vadd.f32 1.0, %v1156_v11  ;;  %v1767_v26 = vadd.f32 -1.0, %v1156_v11 }
 0x212   : > { %v1219_v17 = vmul.f32 %v2055_v15, %v1766_v13  ;;  %v1094_v18 = vmin.f32 %v1061_v14, 20.0 }
 0x213   : > { %2058 = vrcp.f32 %v1188_v16 }
 0x214   : > { %v2057_v19 = vpop.eup %2056  ;;  %v1235_v20 = vmul.f32 %v1219_v17, %v1052_v38  ;;  %v1117_v22 = vmul.f32 1.442695, %v1094_v18 }
 0x215   : > { %v1141_v23 = vadd.f32 1.0, %v2057_v19 }
 0x216   : > { %v1251_v24 = vmin.f32 %v1235_v20, 6.0  ;;  %2060 = vpow2.f32 %v1117_v22 }
 0x217   : > { %v1157_v25 = vmul.f32 %v1141_v23, %v1141_v23  ;;  %v1063_v21 = vpop.f32.mrf.mxu2 }
 0x218   : > { %v1064_v27 = vadd.f32 %v2417_v1, %v1063_v21  ;;  %1782 = vmatmul.msk.f32.gmra.mxu3 %vm378_vm0, %v1251_v24 }
 0x219   : > { %v2059_v28 = vpop.eup %2058  ;;  %v1189_v29 = vadd.f32 1.0, %v1157_v25  ;;  %v1768_v39 = vadd.f32 -1.0, %v1157_v25 }
 0x21a   : > { %v1220_v30 = vmul.f32 %v2059_v28, %v1767_v26  ;;  %v1095_v31 = vmin.f32 %v1064_v27, 20.0 }
 0x21b   : > { %2062 = vrcp.f32 %v1189_v29 }
 0x21c   : > { %v2061_v32 = vpop.eup %2060  ;;  %v1236_v33 = vmul.f32 %v1220_v30, %v1055_v51  ;;  %v1119_v34 = vmul.f32 1.442695, %v1095_v31 }
 0x21d   : > { %v1142_v35 = vadd.f32 1.0, %v2061_v32 }
 0x21e   : > { %v1252_v36 = vmin.f32 %v1236_v33, 6.0  ;;  %2064 = vpow2.f32 %v1119_v34 }
 0x21f   : > { %v1158_v37 = vmul.f32 %v1142_v35, %v1142_v35  ;;  %v1066_v38 = vpop.f32.mrf.mxu2 }
 0x220   : > { %v1067_v40 = vadd.f32 %v2417_v1, %v1066_v38  ;;  %1783 = vmatmul.msk.f32.gmra.mxu3 %vm378_vm0, %v1252_v36 }
 0x221   : > { %v2063_v41 = vpop.eup %2062  ;;  %v1190_v42 = vadd.f32 1.0, %v1158_v37  ;;  %v1769_v52 = vadd.f32 -1.0, %v1158_v37 }
 0x222   : > { %v1221_v43 = vmul.f32 %v2063_v41, %v1768_v39  ;;  %v1096_v45 = vmin.f32 %v1067_v40, 20.0 }
 0x223   : > { %2066 = vrcp.f32 %v1190_v42 }
 0x224   : > { %v2065_v46 = vpop.eup %2064  ;;  %v1237_v47 = vmul.f32 %v1221_v43, %v1058_v0  ;;  %v1121_v48 = vmul.f32 1.442695, %v1096_v45 }
 0x225   : > { %v1143_v44 = vadd.f32 1.0, %v2065_v46 }
 0x226   : > { %v1253_v49 = vmin.f32 %v1237_v47, 6.0  ;;  %2068 = vpow2.f32 %v1121_v48 }
 0x227   : > { %v1159_v50 = vmul.f32 %v1143_v44, %v1143_v44  ;;  %v1069_v51 = vpop.f32.mrf.mxu2 }
 0x228   : > { %v1070_v53 = vadd.f32 %v2417_v1, %v1069_v51  ;;  %1784 = vmatmul.msk.f32.gmra.mxu3 %vm378_vm0, %v1253_v49 }
 0x229   : > { %v2067_v54 = vpop.eup %2066  ;;  %v1191_v55 = vadd.f32 1.0, %v1159_v50  ;;  %v1770_v2 = vadd.f32 -1.0, %v1159_v50 }
 0x22a   : > { %v1222_v56 = vmul.f32 %v2067_v54, %v1769_v52  ;;  %v1097_v57 = vmin.f32 %v1070_v53, 20.0 }
 0x22b   : > { %2070 = vrcp.f32 %v1191_v55 }
 0x22c   : > { %v2069_v58 = vpop.eup %2068  ;;  %v1238_v59 = vmul.f32 %v1222_v56, %v1061_v14  ;;  %v1123_v60 = vmul.f32 1.442695, %v1097_v57 }
 0x22d   : > { %v1144_v61 = vadd.f32 1.0, %v2069_v58 }
 0x22e   : > { %v1254_v62 = vmin.f32 %v1238_v59, 6.0  ;;  %2072 = vpow2.f32 %v1123_v60 }
 0x22f   : > { %v1160_v63 = vmul.f32 %v1144_v61, %v1144_v61  ;;  %v1072_v0 = vpop.f32.mrf.mxu2 }
 0x230   : > { %v1073_v3 = vadd.f32 %v2417_v1, %v1072_v0  ;;  %1785 = vmatmul.msk.f32.gmra.mxu3 %vm378_vm0, %v1254_v62 }
 0x231   : > { %v2071_v4 = vpop.eup %2070  ;;  %v1192_v5 = vadd.f32 1.0, %v1160_v63  ;;  %v1771_v15 = vadd.f32 -1.0, %v1160_v63 }
 0x232   : > { %v1223_v6 = vmul.f32 %v2071_v4, %v1770_v2  ;;  %v1098_v7 = vmin.f32 %v1073_v3, 20.0 }
 0x233   : > { %2074 = vrcp.f32 %v1192_v5 }
 0x234   : > { %v2073_v8 = vpop.eup %2072  ;;  %v1239_v9 = vmul.f32 %v1223_v6, %v1064_v27  ;;  %v1125_v10 = vmul.f32 1.442695, %v1098_v7 }
 0x235   : > { %v1145_v11 = vadd.f32 1.0, %v2073_v8 }
 0x236   : > { %v1255_v12 = vmin.f32 %v1239_v9, 6.0  ;;  %2076 = vpow2.f32 %v1125_v10 }
 0x237   : > { %v1161_v13 = vmul.f32 %v1145_v11, %v1145_v11  ;;  %v1075_v14 = vpop.f32.mrf.mxu2 }
 0x238   : > { %v1076_v16 = vadd.f32 %v2417_v1, %v1075_v14  ;;  %1786 = vmatmul.msk.f32.gmra.mxu3 %vm378_vm0, %v1255_v12 }
 0x239   : > { %v2075_v17 = vpop.eup %2074  ;;  %v1193_v18 = vadd.f32 1.0, %v1161_v13  ;;  %v1772_v28 = vadd.f32 -1.0, %v1161_v13 }
 0x23a   : > { %v1224_v19 = vmul.f32 %v2075_v17, %v1771_v15  ;;  %v1099_v20 = vmin.f32 %v1076_v16, 20.0 }
 0x23b   : > { %2078 = vrcp.f32 %v1193_v18 }
 0x23c   : > { %v2077_v22 = vpop.eup %2076  ;;  %v1240_v23 = vmul.f32 %v1224_v19, %v1067_v40  ;;  %v1127_v24 = vmul.f32 1.442695, %v1099_v20 }
 0x23d   : > { %v1146_v25 = vadd.f32 1.0, %v2077_v22 }
 0x23e   : > { %v1256_v21 = vmin.f32 %v1240_v23, 6.0  ;;  %2080 = vpow2.f32 %v1127_v24  ;;  %v1905_v23 = vld [vmem:[#allocation2] ss:$0 sm:$0xff] }
 0x23f   : > { %v1162_v26 = vmul.f32 %v1146_v25, %v1146_v25  ;;  %v1078_v27 = vpop.f32.mrf.mxu2 }
 0x240   : > { %v1079_v29 = vadd.f32 %v2417_v1, %v1078_v27  ;;  %1787 = vmatmul.msk.f32.gmra.mxu3 %vm378_vm0, %v1256_v21 }
 0x241   : > { %v2079_v30 = vpop.eup %2078  ;;  %v1194_v31 = vadd.f32 1.0, %v1162_v26  ;;  %v1773_v41 = vadd.f32 -1.0, %v1162_v26 }
 0x242   : > { %v1225_v32 = vmul.f32 %v2079_v30, %v1772_v28  ;;  %v1100_v33 = vmin.f32 %v1079_v29, 20.0 }
 0x243   : > { %2082 = vrcp.f32 %v1194_v31 }
 0x244   : > { %v2081_v34 = vpop.eup %2080  ;;  %v1241_v35 = vmul.f32 %v1225_v32, %v1070_v53  ;;  %v1129_v36 = vmul.f32 1.442695, %v1100_v33 }
 0x245   : > { %v1147_v37 = vadd.f32 1.0, %v2081_v34 }
 0x246   : > { %v1257_v38 = vmin.f32 %v1241_v35, 6.0  ;;  %2084 = vpow2.f32 %v1129_v36 }
 0x247   : > { %v1163_v39 = vmul.f32 %v1147_v37, %v1147_v37  ;;  %v1081_v40 = vpop.f32.mrf.mxu2 }
 0x248   : > { %v1082_v42 = vadd.f32 %v2417_v1, %v1081_v40  ;;  %1788 = vmatmul.msk.f32.gmra.mxu3 %vm378_vm0, %v1257_v38 }
 0x249   : > { %v2083_v43 = vpop.eup %2082  ;;  %v1195_v45 = vadd.f32 1.0, %v1163_v39  ;;  %v1774_v54 = vadd.f32 -1.0, %v1163_v39 }
 0x24a   : > { %v1226_v46 = vmul.f32 %v2083_v43, %v1773_v41  ;;  %v1101_v47 = vmin.f32 %v1082_v42, 20.0 }
 0x24b   : > { %2086 = vrcp.f32 %v1195_v45 }
 0x24c   : > { %v2085_v48 = vpop.eup %2084  ;;  %v1242_v44 = vmul.f32 %v1226_v46, %v1073_v3  ;;  %v1131_v49 = vmul.f32 1.442695, %v1101_v47 }
 0x24d   : > { %v1148_v50 = vadd.f32 1.0, %v2085_v48 }
 0x24e   : > { %v1258_v51 = vmin.f32 %v1242_v44, 6.0  ;;  %2088 = vpow2.f32 %v1131_v49 }
 0x24f   : > { %v1164_v52 = vmul.f32 %v1148_v50, %v1148_v50  ;;  %v1084_v53 = vpop.f32.mrf.mxu2 }
 0x250   : > { %v1085_v55 = vadd.f32 %v2417_v1, %v1084_v53  ;;  %1789 = vmatmul.msk.f32.gmra.mxu3 %vm378_vm0, %v1258_v51 }
 0x251   : > { %v2087_v56 = vpop.eup %2086  ;;  %v1196_v57 = vadd.f32 1.0, %v1164_v52  ;;  %v1775_v3 = vadd.f32 -1.0, %v1164_v52 }
 0x252   : > { %v1227_v58 = vmul.f32 %v2087_v56, %v1774_v54  ;;  %v1102_v59 = vmin.f32 %v1085_v55, 20.0 }
 0x253   : > { %2090 = vrcp.f32 %v1196_v57 }
 0x254   : > { %v2089_v60 = vpop.eup %2088  ;;  %v1243_v61 = vmul.f32 %v1227_v58, %v1076_v16  ;;  %v1133_v62 = vmul.f32 1.442695, %v1102_v59 }
 0x255   : > { %v1149_v63 = vadd.f32 1.0, %v2089_v60 }
 0x256   : > { %v1259_v0 = vmin.f32 %v1243_v61, 6.0  ;;  %2092 = vpow2.f32 %v1133_v62 }
 0x257   : > { %v1165_v2 = vmul.f32 %v1149_v63, %v1149_v63 }
 0x258   : > { %1790 = vmatmul.msk.f32.gmra.mxu3 %vm378_vm0, %v1259_v0 }
 0x259   : > { %v2091_v4 = vpop.eup %2090  ;;  %v1197_v5 = vadd.f32 1.0, %v1165_v2  ;;  %v1776_v11 = vadd.f32 -1.0, %v1165_v2 }
 0x25a   : > { %v1228_v1 = vmul.f32 %v2091_v4, %v1775_v3 }
 0x25b   : > { %2094 = vrcp.f32 %v1197_v5 }
 0x25c   : > { %v2093_v6 = vpop.eup %2092  ;;  %v1244_v7 = vmul.f32 %v1228_v1, %v1079_v29 }
 0x25d   : > { %v1150_v8 = vadd.f32 1.0, %v2093_v6 }
 0x25e   : > { %v1260_v9 = vmin.f32 %v1244_v7, 6.0 }
 0x25f   : > { %v1166_v10 = vmul.f32 %v1150_v8, %v1150_v8 }
 0x260   : > { %1791 = vmatmul.msk.f32.gmra.mxu3 %vm378_vm0, %v1260_v9 }
 0x261   : > { %v2095_v12 = vpop.eup %2094  ;;  %v1198_v13 = vadd.f32 1.0, %v1166_v10  ;;  %v1777_v17 = vadd.f32 -1.0, %v1166_v10 }
 0x262   : > { %v1229_v14 = vmul.f32 %v2095_v12, %v1776_v11 }
 0x263   : > { %2096 = vrcp.f32 %v1198_v13 }
 0x264   : > { %v1245_v15 = vmul.f32 %v1229_v14, %v1082_v42 }
 0x266   : > { %v1261_v16 = vmin.f32 %v1245_v15, 6.0 }
 0x268   : > { %1792 = vmatmul.msk.f32.gmra.mxu3 %vm378_vm0, %v1261_v16 }
 0x269   : > { %v2097_v18 = vpop.eup %2096 }
 0x26a   : > { %v1230_v19 = vmul.f32 %v2097_v18, %v1777_v17 }
 0x26c   : > { %v1246_v20 = vmul.f32 %v1230_v19, %v1085_v55 }
 0x26e   : > { %v1262_v22 = vmin.f32 %v1246_v20, 6.0 }
 0x270   : > { %1793 = vmatmul.msk.f32.gmra.mxu3 %vm378_vm0, %v1262_v22 }
 0x27b   : > { %v1334_v24 = vpop.f32.mrf.mxu3 }
 0x27c   : > { %v1335_v25 = vadd.f32 %v1905_v23, %v1334_v24 }
 0x27e   : > { %1383 = vst.msk [vmem:[%s2458_s27] sm:$0xff] %vm1382_vm2, %v1335_v25 }
 0x283   : > { %v1337_v21 = vpop.f32.mrf.mxu3 }
 0x284   : > { %v1338_v26 = vadd.f32 %v1905_v23, %v1337_v21 }
 0x286   : > { %1384 = vst.msk [vmem:[%s2458_s27 + $0x8] sm:$0xff] %vm1382_vm2, %v1338_v26 }
 0x28b   : > { %v1340_v27 = vpop.f32.mrf.mxu3 }
 0x28c   : > { %v1341_v28 = vadd.f32 %v1905_v23, %v1340_v27 }
 0x28e   : > { %1385 = vst.msk [vmem:[%s2458_s27 + $0x10] sm:$0xff] %vm1382_vm2, %v1341_v28 }
 0x293   : > { %v1343_v29 = vpop.f32.mrf.mxu3 }
 0x294   : > { %v1344_v30 = vadd.f32 %v1905_v23, %v1343_v29 }
 0x296   : > { %1386 = vst.msk [vmem:[%s2458_s27 + $0x18] sm:$0xff] %vm1382_vm2, %v1344_v30 }
 0x29b   : > { %v1346_v31 = vpop.f32.mrf.mxu3 }
 0x29c   : > { %v1347_v32 = vadd.f32 %v1905_v23, %v1346_v31 }
 0x29e   : > { %1387 = vst.msk [vmem:[%s2458_s27 + $0x20] sm:$0xff] %vm1382_vm2, %v1347_v32 }
 0x2a3   : > { %v1349_v33 = vpop.f32.mrf.mxu3 }
 0x2a4   : > { %v1350_v34 = vadd.f32 %v1905_v23, %v1349_v33 }
 0x2a6   : > { %1388 = vst.msk [vmem:[%s2458_s27 + $0x28] sm:$0xff] %vm1382_vm2, %v1350_v34 }
 0x2ab   : > { %v1352_v35 = vpop.f32.mrf.mxu3 }
 0x2ac   : > { %v1353_v36 = vadd.f32 %v1905_v23, %v1352_v35 }
 0x2ae   : > { %1389 = vst.msk [vmem:[%s2458_s27 + $0x30] sm:$0xff] %vm1382_vm2, %v1353_v36 }
 0x2b3   : > { %v1355_v37 = vpop.f32.mrf.mxu3 }
 0x2b4   : > { %v1356_v38 = vadd.f32 %v1905_v23, %v1355_v37 }
 0x2b6   : > { %1390 = vst.msk [vmem:[%s2458_s27 + $0x38] sm:$0xff] %vm1382_vm2, %v1356_v38 }
 0x2bb   : > { %v1358_v39 = vpop.f32.mrf.mxu3 }
 0x2bc   : > { %v1359_v40 = vadd.f32 %v1905_v23, %v1358_v39 }
 0x2be   : > { %1391 = vst.msk [vmem:[%s2458_s27 + $0x40] sm:$0xff] %vm1382_vm2, %v1359_v40 }
 0x2c3   : > { %v1361_v41 = vpop.f32.mrf.mxu3 }
 0x2c4   : > { %v1362_v42 = vadd.f32 %v1905_v23, %v1361_v41 }
 0x2c6   : > { %1392 = vst.msk [vmem:[%s2458_s27 + $0x48] sm:$0xff] %vm1382_vm2, %v1362_v42 }
 0x2cb   : > { %v1364_v43 = vpop.f32.mrf.mxu3 }
 0x2cc   : > { %v1365_v45 = vadd.f32 %v1905_v23, %v1364_v43 }
 0x2ce   : > { %1393 = vst.msk [vmem:[%s2458_s27 + $0x50] sm:$0xff] %vm1382_vm2, %v1365_v45 }
 0x2d3   : > { %v1367_v46 = vpop.f32.mrf.mxu3 }
 0x2d4   : > { %v1368_v47 = vadd.f32 %v1905_v23, %v1367_v46 }
 0x2d6   : > { %1394 = vst.msk [vmem:[%s2458_s27 + $0x58] sm:$0xff] %vm1382_vm2, %v1368_v47 }
 0x2db   : > { %v1370_v48 = vpop.f32.mrf.mxu3 }
 0x2dc   : > { %v1371_v44 = vadd.f32 %v1905_v23, %v1370_v48 }
 0x2de   : > { %1395 = vst.msk [vmem:[%s2458_s27 + $0x60] sm:$0xff] %vm1382_vm2, %v1371_v44 }
 0x2e3   : > { %v1373_v49 = vpop.f32.mrf.mxu3 }
 0x2e4   : > { %v1374_v50 = vadd.f32 %v1905_v23, %v1373_v49 }
 0x2e6   : > { %1396 = vst.msk [vmem:[%s2458_s27 + $0x68] sm:$0xff] %vm1382_vm2, %v1374_v50 }
 0x2eb   : > { %v1376_v51 = vpop.f32.mrf.mxu3 }
 0x2ec   : > { %v1377_v52 = vadd.f32 %v1905_v23, %v1376_v51 }
 0x2ee   : > { %1397 = vst.msk [vmem:[%s2458_s27 + $0x70] sm:$0xff] %vm1382_vm2, %v1377_v52 }
 0x2f2   : > { %1405 = sbr.rel (!%p2264_p4) target bundleno = 807 (0x327), region = 60 }
 0x2f3   : > { %v1379_v53 = vpop.f32.mrf.mxu3 }
 0x2f4   : > { %v1380_v54 = vadd.f32 %v1905_v23, %v1379_v53 }
 0x2f6   : > { %1398 = vst.msk [vmem:[%s2458_s27 + $0x78] sm:$0xff] %vm1382_vm2, %v1380_v54 }
 0x2f7   : > { %s2616_s11 = smov (!%p1408_p8, %s1407_s11), 16 }
 0x2f8   : > { %s1796_s13 = sshll.u32 %s2616_s11, 3 }
 0x2f9   : > { %p1799_p9 = scmp.eq.s32.totalorder %s1796_s13, 0 }
 0x2fa   : > { %s2505_s15 = sshrl.u32 (!%p1799_p9), %s2616_s11, 4 }
 0x2fb   : > { %1416 = sbr.rel (%p1799_p9) target bundleno = 807 (0x327), region = 64  ;;  %p1800_p10 = scmp.le.s32.totalorder (!%p1799_p9), %s2505_s15, 0 }
 0x300   : > { %1631 = sbr.rel (%p1800_p10) target bundleno = 790 (0x316), region = 140  ;;  %s2607_s8 = smov (!%p1800_p10), %s2499_s10 }
 0x301   : > { %s2608_s18 = smov (!%p1800_p10), %s2458_s27  ;;  %s2514_s23 = smov (!%p1800_p10), 0  }
 0x302   : > { %s2516_s16 = smov (!%p1800_p10), 0  }
 0x305 LB: >> { %v1509_v55 = vld [vmem:[%s2160_s18] sm:$0xff]  ;;  %v1511_v56 = vld [vmem:[%s2160_s18 + $0x8] sm:$0xff]  ;;  %v1513_v57 = vld [vmem:[%s2160_s18 + $0x10] sm:$0xff]  ;;  %s1541_s19 = sadd.s32 1, %s2164_s23  ;;  %s1503_s16 = sadd.s32 1, %s2168_s16   ;;  %s2168_s16 = sphi %s2516_s16, %s1503_s16   ;;  %s2164_s23 = sphi %s2514_s23, %s2611_s23   ;;  %s2160_s18 = sphi %s2608_s18, %s2610_s18   ;;  %s2156_s8 = sphi %s2607_s8, %s2609_s8  }
 0x306   : >> { %1510 = vst [vmem:[%s2156_s8] sm:$0xff] %v1509_v55  ;;  %v1515_v58 = vld [vmem:[%s2160_s18 + $0x18] sm:$0xff]  ;;  %p1542_p11 = scmp.ge.s32.totalorder %s1541_s19, %s2505_s15  ;;  %v1517_v59 = vld [vmem:[%s2160_s18 + $0x20] sm:$0xff]  ;;  %v1519_v60 = vld [vmem:[%s2160_s18 + $0x28] sm:$0xff]  ;;  %p1502_p12 = scmp.ge.s32.totalorder %s1503_s16, %s2505_s15 }
 0x307   : >> { %1512 = vst [vmem:[%s2156_s8 + $0x8] sm:$0xff] %v1511_v56  ;;  %v1521_v61 = vld [vmem:[%s2160_s18 + $0x30] sm:$0xff]  ;;  %v1523_v62 = vld [vmem:[%s2160_s18 + $0x38] sm:$0xff]  ;;  %v1525_v63 = vld [vmem:[%s2160_s18 + $0x40] sm:$0xff] }
 0x308   : >> { %1514 = vst [vmem:[%s2156_s8 + $0x10] sm:$0xff] %v1513_v57  ;;  %s2618_s19 = smov (%p1542_p11, %s1541_s19), 0  ;;  %v1527_v0 = vld [vmem:[%s2160_s18 + $0x48] sm:$0xff]  ;;  %v1529_v2 = vld [vmem:[%s2160_s18 + $0x50] sm:$0xff]  ;;  %v1531_v3 = vld [vmem:[%s2160_s18 + $0x58] sm:$0xff] }
 0x309   : >> { %1516 = vst [vmem:[%s2156_s8 + $0x18] sm:$0xff] %v1515_v58  ;;  %s1801_s20 = sshll.u32 %s2618_s19, 7  ;;  %v1533_v4 = vld [vmem:[%s2160_s18 + $0x60] sm:$0xff]  ;;  %v1535_v5 = vld [vmem:[%s2160_s18 + $0x68] sm:$0xff]  ;;  %v1537_v1 = vld [vmem:[%s2160_s18 + $0x70] sm:$0xff]  ;;  %s2611_s23 = smov %s2618_s19 }
 0x30a   : >> { %1518 = vst [vmem:[%s2156_s8 + $0x20] sm:$0xff] %v1517_v59  ;;  %s1546_s21 = scalar_lea.vmem %s2458_s27, %s1801_s20 [#allocation3]   ;;  %s1547_s22 = scalar_lea.vmem %s2499_s10, %s1801_s20   ;;  %v1539_v6 = vld [vmem:[%s2160_s18 + $0x78] sm:$0xff] }
 0x30b   : >> { %1520 = vst [vmem:[%s2156_s8 + $0x28] sm:$0xff] %v1519_v60  ;;  %s2610_s18 = smov %s1546_s21 }
 0x30c   : >> { %1522 = vst [vmem:[%s2156_s8 + $0x30] sm:$0xff] %v1521_v61 }
 0x30d   : >> { %1524 = vst [vmem:[%s2156_s8 + $0x38] sm:$0xff] %v1523_v62 }
 0x30e   : >> { %1526 = vst [vmem:[%s2156_s8 + $0x40] sm:$0xff] %v1525_v63 }
 0x30f   : >> { %1528 = vst [vmem:[%s2156_s8 + $0x48] sm:$0xff] %v1527_v0 }
 0x310   : >> { %1530 = vst [vmem:[%s2156_s8 + $0x50] sm:$0xff] %v1529_v2 }
 0x311   : >> { %1532 = vst [vmem:[%s2156_s8 + $0x58] sm:$0xff] %v1531_v3  ;;  %1505 = sbr.rel (!%p1502_p12) target bundleno = 773 (0x305), region = 146 }
 0x312   : >> { %1534 = vst [vmem:[%s2156_s8 + $0x60] sm:$0xff] %v1533_v4 }
 0x313   : >> { %1536 = vst [vmem:[%s2156_s8 + $0x68] sm:$0xff] %v1535_v5 }
 0x314   : >> { %1538 = vst [vmem:[%s2156_s8 + $0x70] sm:$0xff] %v1537_v1 }
 0x315   : >> { %1540 = vst [vmem:[%s2156_s8 + $0x78] sm:$0xff] %v1539_v6  ;;  %s2609_s8 = smov %s1547_s22 }
 0x316 PF: > { %s2578_s24 = sand.u32 15, %s2616_s11   ;;  %s1812_s25 = sshll.u32 %s2505_s15, 7 }
 0x317   : > { %s1552_s26 = scalar_lea.vmem %s2458_s27, %s1812_s25 [#allocation3]   ;;  %s1554_s28 = scalar_lea.vmem %s2499_s10, %s1812_s25  }
 0x318   : > { %p1806_p13 = scmp.le.s32.totalorder %s2578_s24, 0 }
 0x319   : > { %s2170_s29 = smov (!%p1806_p13), %s1554_s28   ;;  %s2174_s30 = smov (!%p1806_p13), %s1552_s26  }
 0x31a   : > { %1645 = sbr.rel (%p1806_p13) target bundleno = 807 (0x327), region = 151  ;;  %s2178_s13 = smov (!%p1806_p13), 0  }
 0x31b   : > { %s2182_s19 = smov (!%p1806_p13), 0  }
 0x31f LB: >> { %v1564_v7 = vld [vmem:[%s2176_s30] sm:$0xff]  ;;  %s1566_s11 = sadd.s32 1, %s2180_s13  ;;  %s1558_s19 = sadd.s32 1, %s2184_s19   ;;  %s2184_s19 = sphi %s2182_s19, %s1558_s19   ;;  %s2180_s13 = sphi %s2178_s13, %s2179_s13   ;;  %s2176_s30 = sphi %s2174_s30, %s1571_s30   ;;  %s2172_s29 = sphi %s2170_s29, %s1572_s29  }
 0x320   : >> { %1565 = vst [vmem:[%s2172_s29] sm:$0xff] %v1564_v7  ;;  %p1567_p0 = scmp.ge.s32.totalorder %s1566_s11, %s2578_s24  ;;  %p1557_p1 = scmp.ge.s32.totalorder %s1558_s19, %s2578_s24 }
 0x322   : >> { %s2620_s11 = smov (%p1567_p0, %s1566_s11), 0  ;;  %1560 = sbr.rel (!%p1557_p1) target bundleno = 799 (0x31f), region = 157 }
 0x323   : >> { %s1807_s27 = sshll.u32 %s2620_s11, 3  ;;  %s2179_s13 = smov %s2620_s11  }
 0x324   : >> { %s1571_s30 = scalar_lea.vmem %s1552_s26, %s1807_s27 [#allocation3]   ;;  %s1572_s29 = scalar_lea.vmem %s1554_s28, %s1807_s27  }
 0x327 PF: > { %p18_p2 = scmp.ge.s32.totalorder %s2254_s14, 4   ;;  %s2612_s11 = smov %s2148_s12 }
 0x328   : > { %s2613_s12 = smov %s2262_s17  ;;  %s2614_s13 = smov %s2254_s14 }
 0x329   :  { %20 = sbr.rel (!%p18_p2) target bundleno = 5 (0x5), region = 168 }

</bundles_post_ra>
